<compile_context>
chip_gen: v7x
topology: tpu7x:2x2x1
jax: 0.10.0
libtpu: 0.0.40
codegen_flags: <defaults>
</compile_context>

<pallas_src>
import math

import numpy as np
import jax
import jax.numpy as jnp
from jax import lax
from jax.experimental import pallas as pl
from jax.experimental.pallas import tpu as pltpu


# ------------------------------ fused kernel ------------------------------- #

def _make_network_block_kernel(H, W, Cin, Cout, stride, nb_layers, equal0):
    H1 = (H - 1) // stride + 1
    W1 = (W - 1) // stride + 1
    K0 = W * Cin      # lane width of the layer-0 padded slab
    K1 = W1 * Cout    # lane width of every later slab and of the output

    def kernel(*refs):
        it = iter(refs)
        x_ref = next(it)
        layers = []
        for li in range(nb_layers):
            d = {"s1": next(it), "b1": next(it)}
            if li == 0 and stride > 1:
                d["rs"] = next(it)
            d["t1"] = next(it)
            d["s2"] = next(it)
            d["b2"] = next(it)
            d["t2"] = next(it)
            layers.append(d)
        o_ref = next(it)
        pad0 = next(it)   # (H + 2, K0)  bf16 scratch (layer-0 conv1)
        pad1 = next(it)   # (H1 + 2, K1) bf16 scratch (all other convs)

        # Zero only the border rows; interior rows are always fully
        # overwritten below.  Done every grid step: cheap and megacore-safe.
        pad0[0:1, :] = jnp.zeros((1, K0), jnp.bfloat16)
        pad0[H + 1:H + 2, :] = jnp.zeros((1, K0), jnp.bfloat16)
        pad1[0:1, :] = jnp.zeros((1, K1), jnp.bfloat16)
        pad1[H1 + 1:H1 + 2, :] = jnp.zeros((1, K1), jnp.bfloat16)

        def conv(pad_ref, t_ref, rows_pre=None):
            # y[i, :] = sum_ky  padded_row(i*stride + ky) @ T[ky]
            # (column stride + zero padding along W are folded into T).
            acc = None
            for ky in range(3):
                if rows_pre is not None:
                    rows = rows_pre[ky * H1:(ky + 1) * H1]
                else:
                    rows = pad_ref[ky:ky + H1, :]
                p = jnp.dot(rows, t_ref[ky], preferred_element_type=jnp.float32)
                acc = p if acc is None else acc + p
            return acc

        # ------------------------------ layer 0 ------------------------------
        l0 = layers[0]
        x = x_ref[0]                                              # (H, K0) f32
        a = jnp.maximum(x * l0["s1"][...] + l0["b1"][...], 0.0)   # BN1 + ReLU
        pad0[1:H + 1, :] = a.astype(jnp.bfloat16)

        rows_pre = None
        if stride > 1:
            # Exact 0/1 gather of the strided rows (tiny MXU op) instead of
            # the old full-resolution (H1*W1, H*W) selection matmul.
            rows_pre = jnp.dot(l0["rs"][...], pad0[...],
                               preferred_element_type=jnp.float32
                               ).astype(jnp.bfloat16)             # (3*H1, K0)

        z = conv(pad0, l0["t1"], rows_pre)     # (H1, K1) or (H1, 2*K1)
        y1 = z[:, :K1]
        short = x if equal0 else z[:, K1:]     # identity / folded 1x1 shortcut

        y1a = jnp.maximum(y1 * l0["s2"][...] + l0["b2"][...], 0.0)  # BN2+ReLU
        pad1[1:H1 + 1, :] = y1a.astype(jnp.bfloat16)
        xcur = short + conv(pad1, l0["t2"])                        # residual

        # --------------------------- layers 1 .. L-1 --------------------------
        for li in range(1, nb_layers):
            l = layers[li]
            a = jnp.maximum(xcur * l["s1"][...] + l["b1"][...], 0.0)
            pad1[1:H1 + 1, :] = a.astype(jnp.bfloat16)
            u1 = conv(pad1, l["t1"])
            u1a = jnp.maximum(u1 * l["s2"][...] + l["b2"][...], 0.0)
            pad1[1:H1 + 1, :] = u1a.astype(jnp.bfloat16)
            xcur = xcur + conv(pad1, l["t2"])          # identity shortcut

        o_ref[...] = xcur.reshape(1, H1, K1).astype(o_ref.dtype)

    return kernel


# --------------------------- host-side weight packing ----------------------- #

def _toeplitz_3x3(w_hwio, w_in, w_out, stride):
    """(3,3,Cin,Cout) conv weight -> (3, w_in*Cin, w_out*Cout) per-ky Toeplitz
    matrices (column stride + zero padding along W folded in)."""
    _, _, cin, cout = w_hwio.shape
    w = np.asarray(w_hwio, np.float32)
    t = np.zeros((3, w_in * cin, w_out * cout), np.float32)
    for wo in range(w_out):
        for kx in range(3):
            wi = wo * stride + kx - 1
            if 0 <= wi < w_in:
                t[:, wi * cin:(wi + 1) * cin, wo * cout:(wo + 1) * cout] = w[:, kx]
    return t


def _toeplitz_1x1_center(ws, w_in, w_out, stride):
    """1x1 shortcut conv folded onto the ky=1 (center-row) Toeplitz slot."""
    cin, cout = ws.shape
    w = np.asarray(ws, np.float32)
    t = np.zeros((3, w_in * cin, w_out * cout), np.float32)
    for wo in range(w_out):
        wi = wo * stride
        t[1, wi * cin:(wi + 1) * cin, wo * cout:(wo + 1) * cout] = w
    return t


def _row_gather(h_in, h_out, stride):
    """(3*h_out, h_in+2) 0/1 matrix: row ky*h_out+i selects padded row i*stride+ky."""
    rs = np.zeros((3 * h_out, h_in + 2), np.float32)
    for ky in range(3):
        for i in range(h_out):
            rs[ky * h_out + i, i * stride + ky] = 1.0
    return rs


def pack_network_block(block_params, H, W, stride):
    """Pre-pack (outside jit) all weights into the lane-dense kernel format."""
    nb_layers = len(block_params)
    cin0 = block_params[0]["w1"].shape[2]
    cout = block_params[0]["w1"].shape[3]
    equal0 = block_params[0]["ws"] is None
    assert (not equal0) or stride == 1, "identity shortcut requires stride 1"
    H1 = (H - 1) // stride + 1
    W1 = (W - 1) // stride + 1

    tensors = []
    for li, p in enumerate(block_params):
        s = stride if li == 0 else 1
        w_in = W if li == 0 else W1
        h_in = H if li == 0 else H1
        s1 = np.asarray(p["scale1"], np.float32)
        b1 = np.asarray(p["shift1"], np.float32)
        s2 = np.asarray(p["scale2"], np.float32)
        b2 = np.asarray(p["shift2"], np.float32)
        tensors.append(jnp.asarray(np.tile(s1, w_in)[None, :]))
        tensors.append(jnp.asarray(np.tile(b1, w_in)[None, :]))
        if li == 0 and stride > 1:
            tensors.append(jnp.asarray(_row_gather(h_in, H1, stride),
                                       jnp.bfloat16))
        t1 = _toeplitz_3x3(p["w1"], w_in, W1, s)
        if li == 0 and not equal0:
            t1 = np.concatenate(
                [t1, _toeplitz_1x1_center(p["ws"], w_in, W1, s)], axis=2)
        tensors.append(jnp.asarray(t1, jnp.bfloat16))
        tensors.append(jnp.asarray(np.tile(s2, W1)[None, :]))
        tensors.append(jnp.asarray(np.tile(b2, W1)[None, :]))
        tensors.append(jnp.asarray(_toeplitz_3x3(p["w2"], W1, W1, 1),
                                   jnp.bfloat16))

    cfg = (H, W, cin0, cout, stride, nb_layers, equal0)
    return cfg, tensors


# --------------------------------- wrapper ----------------------------------- #

def _const_idx(ndim):
    def imap(n):
        return (0,) * ndim
    return imap


def network_block_forward(x_nchw, packed, cfg):
    """NetworkBlock.forward (NCHW in / NCHW out) as one fused pallas_call."""
    H, W, Cin, Cout, stride, nb_layers, equal0 = cfg
    N = x_nchw.shape[0]
    H1 = (H - 1) // stride + 1
    W1 = (W - 1) // stride + 1
    K0, K1 = W * Cin, W1 * Cout

    # Layout plumbing only: NCHW -> lane-dense (N, H, W*Cin) slabs.
    x = jnp.transpose(x_nchw, (0, 2, 3, 1)).reshape(N, H, K0)

    in_specs = [pl.BlockSpec((1, H, K0), lambda n: (n, 0, 0))]
    for t in packed:
        in_specs.append(pl.BlockSpec(t.shape, _const_idx(t.ndim)))

    flops = 0
    bytes_accessed = x.size * x.dtype.itemsize + N * H1 * K1 * 4
    for t in packed:
        bytes_accessed += t.size * t.dtype.itemsize
        if t.ndim == 3:                       # Toeplitz conv weights
            flops += 2 * H1 * t.shape[0] * t.shape[1] * t.shape[2]
        elif t.shape[0] > 1:                  # row-gather matrix
            flops += 2 * t.shape[0] * t.shape[1] * K0
    flops *= N

    y = pl.pallas_call(
        _make_network_block_kernel(H, W, Cin, Cout, stride, nb_layers, equal0),
        out_shape=jax.ShapeDtypeStruct((N, H1, K1), x_nchw.dtype),
        grid=(N,),
        in_specs=in_specs,
        out_specs=pl.BlockSpec((1, H1, K1), lambda n: (n, 0, 0)),
        scratch_shapes=[
            pltpu.VMEM((H + 2, K0), jnp.bfloat16),
            pltpu.VMEM((H1 + 2, K1), jnp.bfloat16),
        ],
        compiler_params=pltpu.CompilerParams(
            dimension_semantics=("parallel",)),
        cost_estimate=pl.CostEstimate(flops=int(flops), transcendentals=0,
                                      bytes_accessed=int(bytes_accessed)),
    )(x, *packed)

    return jnp.transpose(y.reshape(N, H1, W1, Cout), (0, 3, 1, 2))


# --------------------------- parameter creation ----------------------------- #

def init_basic_block(key, in_planes, out_planes):
    ks = jax.random.split(key, 5)
    eps = 1e-5

    def bn_fold(k, c):
        k1, k2, k3, k4 = jax.random.split(k, 4)
        gamma = 1.0 + 0.1 * jax.random.normal(k1, (c,), jnp.float32)
        beta = 0.1 * jax.random.normal(k2, (c,), jnp.float32)
        mean = 0.1 * jax.random.normal(k3, (c,), jnp.float32)
        var = 1.0 + 0.1 * jnp.abs(jax.random.normal(k4, (c,), jnp.float32))
        scale = gamma / jnp.sqrt(var + eps)
        return scale, beta - mean * scale

    scale1, shift1 = bn_fold(ks[0], in_planes)
    scale2, shift2 = bn_fold(ks[1], out_planes)
    w1 = jax.random.normal(ks[2], (3, 3, in_planes, out_planes), jnp.float32) \
        * math.sqrt(2.0 / (9 * in_planes))
    w2 = jax.random.normal(ks[3], (3, 3, out_planes, out_planes), jnp.float32) \
        * math.sqrt(2.0 / (9 * out_planes))
    ws = None if in_planes == out_planes else (
        jax.random.normal(ks[4], (in_planes, out_planes), jnp.float32)
        * math.sqrt(2.0 / in_planes))
    return dict(scale1=scale1, shift1=shift1, scale2=scale2, shift2=shift2,
                w1=w1, w2=w2, ws=ws)


def init_network_block(key, nb_layers, in_planes, out_planes):
    keys = jax.random.split(key, nb_layers)
    return [init_basic_block(keys[i], in_planes if i == 0 else out_planes,
                             out_planes)
            for i in range(nb_layers)]


# ---------------------------- pure-JAX reference ----------------------------- #

def _ref_conv(x, w_hwio, stride, pad):
    # Mirrors the kernel's bf16 matmul operands with f32 accumulation.
    return lax.conv_general_dilated(
        x.astype(jnp.bfloat16), w_hwio.astype(jnp.bfloat16),
        (stride, stride), [(pad, pad), (pad, pad)],
        dimension_numbers=("NHWC", "HWIO", "NHWC"),
        preferred_element_type=jnp.float32)


def reference_forward(x_nchw, block_params, stride):
    x = jnp.transpose(x_nchw, (0, 2, 3, 1))
    for i, p in enumerate(block_params):
        s = stride if i == 0 else 1
        x_act = jnp.maximum(x * p["scale1"] + p["shift1"], 0.0)
        out = _ref_conv(x_act, p["w1"], s, 1)
        out = jnp.maximum(out * p["scale2"] + p["shift2"], 0.0)
        out = _ref_conv(out, p["w2"], 1, 1)
        if p["ws"] is None:
            short = x
        else:
            ws = p["ws"].reshape(1, 1, *p["ws"].shape)
            short = _ref_conv(x_act, ws, s, 0)
        x = short + out
    return jnp.transpose(x, (0, 3, 1, 2))


# ------------------------------------ main ----------------------------------- #

if __name__ == "__main__":
    key = jax.random.PRNGKey(0)
    k_x, k_p = jax.random.split(key)

    # Small WRN-like NetworkBlock: 2 layers, 8 -> 16 channels, stride 2.
    N, C_in, H, W = 2, 8, 16, 16
    out_planes, nb_layers, stride = 16, 2, 2

    x = jax.random.normal(k_x, (N, C_in, H, W), jnp.float32)   # NCHW (PyTorch)
    params = init_network_block(k_p, nb_layers, C_in, out_planes)
    cfg, packed = pack_network_block(params, H, W, stride)     # outside jit

    fwd = jax.jit(network_block_forward, static_argnums=(2,))
    y = jax.block_until_ready(fwd(x, packed, cfg))
    assert y.shape == (N, out_planes, H // stride, W // stride), y.shape

    y_ref = jax.block_until_ready(reference_forward(x, params, stride))
    max_err = float(jnp.max(jnp.abs(y - y_ref)))
    assert jnp.allclose(y, y_ref, atol=1e-2, rtol=1e-2), max_err

    print("KERNEL_OK")
</pallas_src>

<mosaic_0001>
module attributes {stable_mosaic.version = 11 : i64} {
  func.func @kernel(%arg0: i32, %arg1: memref<1x16x128xf32, #tpu.memory_space<vmem>>, %arg2: memref<1x128xf32, #tpu.memory_space<vmem>>, %arg3: memref<1x128xf32, #tpu.memory_space<vmem>>, %arg4: memref<24x18xbf16, #tpu.memory_space<vmem>>, %arg5: memref<3x128x256xbf16, #tpu.memory_space<vmem>>, %arg6: memref<1x128xf32, #tpu.memory_space<vmem>>, %arg7: memref<1x128xf32, #tpu.memory_space<vmem>>, %arg8: memref<3x128x128xbf16, #tpu.memory_space<vmem>>, %arg9: memref<1x128xf32, #tpu.memory_space<vmem>>, %arg10: memref<1x128xf32, #tpu.memory_space<vmem>>, %arg11: memref<3x128x128xbf16, #tpu.memory_space<vmem>>, %arg12: memref<1x128xf32, #tpu.memory_space<vmem>>, %arg13: memref<1x128xf32, #tpu.memory_space<vmem>>, %arg14: memref<3x128x128xbf16, #tpu.memory_space<vmem>>, %arg15: memref<1x8x128xf32, #tpu.memory_space<vmem>>, %arg16: memref<18x128xbf16, #tpu.memory_space<vmem>>, %arg17: memref<10x128xbf16, #tpu.memory_space<vmem>>) attributes {dimension_semantics = [#tpu.dimension_semantics<parallel>], iteration_bounds = array<i64: 2>, scalar_prefetch = 0 : i64, scratch_operands = 2 : i64, tpu.core_type = #tpu.core_type<tc>, window_params = [{transform_indices = @transform_0, window_bounds = array<i64: 1, 16, 128>}, {pipeline_mode = #tpu.pipeline_mode<synchronous>, transform_indices = @transform_1, window_bounds = array<i64: 1, 128>}, {pipeline_mode = #tpu.pipeline_mode<synchronous>, transform_indices = @transform_2, window_bounds = array<i64: 1, 128>}, {pipeline_mode = #tpu.pipeline_mode<synchronous>, transform_indices = @transform_3, window_bounds = array<i64: 24, 18>}, {pipeline_mode = #tpu.pipeline_mode<synchronous>, transform_indices = @transform_4, window_bounds = array<i64: 3, 128, 256>}, {pipeline_mode = #tpu.pipeline_mode<synchronous>, transform_indices = @transform_5, window_bounds = array<i64: 1, 128>}, {pipeline_mode = #tpu.pipeline_mode<synchronous>, transform_indices = @transform_6, window_bounds = array<i64: 1, 128>}, {pipeline_mode = #tpu.pipeline_mode<synchronous>, transform_indices = @transform_7, window_bounds = array<i64: 3, 128, 128>}, {pipeline_mode = #tpu.pipeline_mode<synchronous>, transform_indices = @transform_8, window_bounds = array<i64: 1, 128>}, {pipeline_mode = #tpu.pipeline_mode<synchronous>, transform_indices = @transform_9, window_bounds = array<i64: 1, 128>}, {pipeline_mode = #tpu.pipeline_mode<synchronous>, transform_indices = @transform_10, window_bounds = array<i64: 3, 128, 128>}, {pipeline_mode = #tpu.pipeline_mode<synchronous>, transform_indices = @transform_11, window_bounds = array<i64: 1, 128>}, {pipeline_mode = #tpu.pipeline_mode<synchronous>, transform_indices = @transform_12, window_bounds = array<i64: 1, 128>}, {pipeline_mode = #tpu.pipeline_mode<synchronous>, transform_indices = @transform_13, window_bounds = array<i64: 3, 128, 128>}, {transform_indices = @transform_14, window_bounds = array<i64: 1, 8, 128>}]} {
    %cst = arith.constant 0.000000e+00 : bf16
    %0 = vector.broadcast %cst : bf16 to vector<1x128xbf16>
    %c0 = arith.constant 0 : index
    %c0_0 = arith.constant 0 : index
    %1 = vector.load %arg16[%c0, %c0_0] : memref<18x128xbf16, #tpu.memory_space<vmem>>, vector<1x128xbf16>
    tpu.vector_store %arg16[%c0, %c0_0], %0 {strides = array<i32>} : memref<18x128xbf16, #tpu.memory_space<vmem>>, vector<1x128xbf16>,
    %cst_1 = arith.constant 0.000000e+00 : bf16
    %2 = vector.broadcast %cst_1 : bf16 to vector<1x128xbf16>
    %c17 = arith.constant 17 : index
    %c0_2 = arith.constant 0 : index
    %3 = vector.load %arg16[%c17, %c0_2] : memref<18x128xbf16, #tpu.memory_space<vmem>>, vector<1x128xbf16>
    tpu.vector_store %arg16[%c17, %c0_2], %2 {strides = array<i32>} : memref<18x128xbf16, #tpu.memory_space<vmem>>, vector<1x128xbf16>,
    %cst_3 = arith.constant 0.000000e+00 : bf16
    %4 = vector.broadcast %cst_3 : bf16 to vector<1x128xbf16>
    %c0_4 = arith.constant 0 : index
    %c0_5 = arith.constant 0 : index
    %5 = vector.load %arg17[%c0_4, %c0_5] : memref<10x128xbf16, #tpu.memory_space<vmem>>, vector<1x128xbf16>
    tpu.vector_store %arg17[%c0_4, %c0_5], %4 {strides = array<i32>} : memref<10x128xbf16, #tpu.memory_space<vmem>>, vector<1x128xbf16>,
    %cst_6 = arith.constant 0.000000e+00 : bf16
    %6 = vector.broadcast %cst_6 : bf16 to vector<1x128xbf16>
    %c9 = arith.constant 9 : index
    %c0_7 = arith.constant 0 : index
    %7 = vector.load %arg17[%c9, %c0_7] : memref<10x128xbf16, #tpu.memory_space<vmem>>, vector<1x128xbf16>
    tpu.vector_store %arg17[%c9, %c0_7], %6 {strides = array<i32>} : memref<10x128xbf16, #tpu.memory_space<vmem>>, vector<1x128xbf16>,
    %c0_8 = arith.constant 0 : index
    %c0_9 = arith.constant 0 : index
    %c0_10 = arith.constant 0 : index
    %8 = vector.load %arg1[%c0_8, %c0_9, %c0_10] : memref<1x16x128xf32, #tpu.memory_space<vmem>>, vector<1x16x128xf32>
    %9 = vector.shape_cast %8 : vector<1x16x128xf32> to vector<16x128xf32>
    %c0_11 = arith.constant 0 : index
    %c0_12 = arith.constant 0 : index
    %10 = vector.load %arg2[%c0_11, %c0_12] : memref<1x128xf32, #tpu.memory_space<vmem>>, vector<1x128xf32>
    %11 = vector.broadcast %10 : vector<1x128xf32> to vector<16x128xf32>
    %12 = arith.mulf %9, %11 : vector<16x128xf32>
    %c0_13 = arith.constant 0 : index
    %c0_14 = arith.constant 0 : index
    %13 = vector.load %arg3[%c0_13, %c0_14] : memref<1x128xf32, #tpu.memory_space<vmem>>, vector<1x128xf32>
    %14 = vector.broadcast %13 : vector<1x128xf32> to vector<16x128xf32>
    %15 = arith.addf %12, %14 : vector<16x128xf32>
    %cst_15 = arith.constant 0.000000e+00 : f32
    %16 = vector.broadcast %cst_15 : f32 to vector<16x128xf32>
    %17 = arith.maximumf %15, %16 : vector<16x128xf32>
    %18 = arith.truncf %17 : vector<16x128xf32> to vector<16x128xbf16>
    %c1 = arith.constant 1 : index
    %c0_16 = arith.constant 0 : index
    %19 = vector.load %arg16[%c1, %c0_16] : memref<18x128xbf16, #tpu.memory_space<vmem>>, vector<16x128xbf16>
    tpu.vector_store %arg16[%c1, %c0_16], %18 {strides = array<i32>} : memref<18x128xbf16, #tpu.memory_space<vmem>>, vector<16x128xbf16>,
    %c0_17 = arith.constant 0 : index
    %c0_18 = arith.constant 0 : index
    %20 = vector.load %arg4[%c0_17, %c0_18] : memref<24x18xbf16, #tpu.memory_space<vmem>>, vector<24x18xbf16>
    %c0_19 = arith.constant 0 : index
    %c0_20 = arith.constant 0 : index
    %21 = vector.load %arg16[%c0_19, %c0_20] : memref<18x128xbf16, #tpu.memory_space<vmem>>, vector<18x128xbf16>
    %cst_21 = arith.constant dense<0.000000e+00> : vector<24x128xf32>
    %22 = tpu.matmul %20, %21, %cst_21 {dimension_numbers = #tpu.dot_dimension_numbers<[1], [0], [0], [1], [0, 0, 1, 1], [], []>} : vector<24x18xbf16>, vector<18x128xbf16>, vector<24x128xf32> -> vector<24x128xf32>
    %23 = arith.truncf %22 : vector<24x128xf32> to vector<24x128xbf16>
    %24 = vector.extract_strided_slice %23 {offsets = [0, 0], sizes = [8, 128], strides = [1, 1]} : vector<24x128xbf16> to vector<8x128xbf16>
    %c0_22 = arith.constant 0 : index
    %c0_23 = arith.constant 0 : index
    %c0_24 = arith.constant 0 : index
    %25 = vector.load %arg5[%c0_22, %c0_23, %c0_24] : memref<3x128x256xbf16, #tpu.memory_space<vmem>>, vector<1x128x256xbf16>
    %26 = vector.shape_cast %25 : vector<1x128x256xbf16> to vector<128x256xbf16>
    %cst_25 = arith.constant dense<0.000000e+00> : vector<8x256xf32>
    %27 = tpu.matmul %24, %26, %cst_25 {dimension_numbers = #tpu.dot_dimension_numbers<[1], [0], [0], [1], [0, 0, 1, 1], [], []>} : vector<8x128xbf16>, vector<128x256xbf16>, vector<8x256xf32> -> vector<8x256xf32>
    %28 = vector.extract_strided_slice %23 {offsets = [8, 0], sizes = [8, 128], strides = [1, 1]} : vector<24x128xbf16> to vector<8x128xbf16>
    %c1_26 = arith.constant 1 : index
    %c0_27 = arith.constant 0 : index
    %c0_28 = arith.constant 0 : index
    %29 = vector.load %arg5[%c1_26, %c0_27, %c0_28] : memref<3x128x256xbf16, #tpu.memory_space<vmem>>, vector<1x128x256xbf16>
    %30 = vector.shape_cast %29 : vector<1x128x256xbf16> to vector<128x256xbf16>
    %cst_29 = arith.constant dense<0.000000e+00> : vector<8x256xf32>
    %31 = tpu.matmul %28, %30, %cst_29 {dimension_numbers = #tpu.dot_dimension_numbers<[1], [0], [0], [1], [0, 0, 1, 1], [], []>} : vector<8x128xbf16>, vector<128x256xbf16>, vector<8x256xf32> -> vector<8x256xf32>
    %32 = arith.addf %27, %31 : vector<8x256xf32>
    %33 = vector.extract_strided_slice %23 {offsets = [16, 0], sizes = [8, 128], strides = [1, 1]} : vector<24x128xbf16> to vector<8x128xbf16>
    %c2 = arith.constant 2 : index
    %c0_30 = arith.constant 0 : index
    %c0_31 = arith.constant 0 : index
    %34 = vector.load %arg5[%c2, %c0_30, %c0_31] : memref<3x128x256xbf16, #tpu.memory_space<vmem>>, vector<1x128x256xbf16>
    %35 = vector.shape_cast %34 : vector<1x128x256xbf16> to vector<128x256xbf16>
    %cst_32 = arith.constant dense<0.000000e+00> : vector<8x256xf32>
    %36 = tpu.matmul %33, %35, %cst_32 {dimension_numbers = #tpu.dot_dimension_numbers<[1], [0], [0], [1], [0, 0, 1, 1], [], []>} : vector<8x128xbf16>, vector<128x256xbf16>, vector<8x256xf32> -> vector<8x256xf32>
    %37 = arith.addf %32, %36 : vector<8x256xf32>
    %38 = vector.extract_strided_slice %37 {offsets = [0, 0], sizes = [8, 128], strides = [1, 1]} : vector<8x256xf32> to vector<8x128xf32>
    %39 = vector.extract_strided_slice %37 {offsets = [0, 128], sizes = [8, 128], strides = [1, 1]} : vector<8x256xf32> to vector<8x128xf32>
    %c0_33 = arith.constant 0 : index
    %c0_34 = arith.constant 0 : index
    %40 = vector.load %arg6[%c0_33, %c0_34] : memref<1x128xf32, #tpu.memory_space<vmem>>, vector<1x128xf32>
    %41 = vector.broadcast %40 : vector<1x128xf32> to vector<8x128xf32>
    %42 = arith.mulf %38, %41 : vector<8x128xf32>
    %c0_35 = arith.constant 0 : index
    %c0_36 = arith.constant 0 : index
    %43 = vector.load %arg7[%c0_35, %c0_36] : memref<1x128xf32, #tpu.memory_space<vmem>>, vector<1x128xf32>
    %44 = vector.broadcast %43 : vector<1x128xf32> to vector<8x128xf32>
    %45 = arith.addf %42, %44 : vector<8x128xf32>
    %cst_37 = arith.constant 0.000000e+00 : f32
    %46 = vector.broadcast %cst_37 : f32 to vector<8x128xf32>
    %47 = arith.maximumf %45, %46 : vector<8x128xf32>
    %48 = arith.truncf %47 : vector<8x128xf32> to vector<8x128xbf16>
    %c1_38 = arith.constant 1 : index
    %c0_39 = arith.constant 0 : index
    %49 = vector.load %arg17[%c1_38, %c0_39] : memref<10x128xbf16, #tpu.memory_space<vmem>>, vector<8x128xbf16>
    tpu.vector_store %arg17[%c1_38, %c0_39], %48 {strides = array<i32>} : memref<10x128xbf16, #tpu.memory_space<vmem>>, vector<8x128xbf16>,
    %c0_40 = arith.constant 0 : index
    %c0_41 = arith.constant 0 : index
    %50 = vector.load %arg17[%c0_40, %c0_41] : memref<10x128xbf16, #tpu.memory_space<vmem>>, vector<8x128xbf16>
    %c0_42 = arith.constant 0 : index
    %c0_43 = arith.constant 0 : index
    %c0_44 = arith.constant 0 : index
    %51 = vector.load %arg8[%c0_42, %c0_43, %c0_44] : memref<3x128x128xbf16, #tpu.memory_space<vmem>>, vector<1x128x128xbf16>
    %52 = vector.shape_cast %51 : vector<1x128x128xbf16> to vector<128x128xbf16>
    %cst_45 = arith.constant dense<0.000000e+00> : vector<8x128xf32>
    %53 = tpu.matmul %50, %52, %cst_45 {dimension_numbers = #tpu.dot_dimension_numbers<[1], [0], [0], [1], [0, 0, 1, 1], [], []>} : vector<8x128xbf16>, vector<128x128xbf16>, vector<8x128xf32> -> vector<8x128xf32>
    %c1_46 = arith.constant 1 : index
    %c0_47 = arith.constant 0 : index
    %54 = vector.load %arg17[%c1_46, %c0_47] : memref<10x128xbf16, #tpu.memory_space<vmem>>, vector<8x128xbf16>
    %c1_48 = arith.constant 1 : index
    %c0_49 = arith.constant 0 : index
    %c0_50 = arith.constant 0 : index
    %55 = vector.load %arg8[%c1_48, %c0_49, %c0_50] : memref<3x128x128xbf16, #tpu.memory_space<vmem>>, vector<1x128x128xbf16>
    %56 = vector.shape_cast %55 : vector<1x128x128xbf16> to vector<128x128xbf16>
    %cst_51 = arith.constant dense<0.000000e+00> : vector<8x128xf32>
    %57 = tpu.matmul %54, %56, %cst_51 {dimension_numbers = #tpu.dot_dimension_numbers<[1], [0], [0], [1], [0, 0, 1, 1], [], []>} : vector<8x128xbf16>, vector<128x128xbf16>, vector<8x128xf32> -> vector<8x128xf32>
    %58 = arith.addf %53, %57 : vector<8x128xf32>
    %c2_52 = arith.constant 2 : index
    %c0_53 = arith.constant 0 : index
    %59 = vector.load %arg17[%c2_52, %c0_53] : memref<10x128xbf16, #tpu.memory_space<vmem>>, vector<8x128xbf16>
    %c2_54 = arith.constant 2 : index
    %c0_55 = arith.constant 0 : index
    %c0_56 = arith.constant 0 : index
    %60 = vector.load %arg8[%c2_54, %c0_55, %c0_56] : memref<3x128x128xbf16, #tpu.memory_space<vmem>>, vector<1x128x128xbf16>
    %61 = vector.shape_cast %60 : vector<1x128x128xbf16> to vector<128x128xbf16>
    %cst_57 = arith.constant dense<0.000000e+00> : vector<8x128xf32>
    %62 = tpu.matmul %59, %61, %cst_57 {dimension_numbers = #tpu.dot_dimension_numbers<[1], [0], [0], [1], [0, 0, 1, 1], [], []>} : vector<8x128xbf16>, vector<128x128xbf16>, vector<8x128xf32> -> vector<8x128xf32>
    %63 = arith.addf %58, %62 : vector<8x128xf32>
    %64 = arith.addf %39, %63 : vector<8x128xf32>
    %c0_58 = arith.constant 0 : index
    %c0_59 = arith.constant 0 : index
    %65 = vector.load %arg9[%c0_58, %c0_59] : memref<1x128xf32, #tpu.memory_space<vmem>>, vector<1x128xf32>
    %66 = vector.broadcast %65 : vector<1x128xf32> to vector<8x128xf32>
    %67 = arith.mulf %64, %66 : vector<8x128xf32>
    %c0_60 = arith.constant 0 : index
    %c0_61 = arith.constant 0 : index
    %68 = vector.load %arg10[%c0_60, %c0_61] : memref<1x128xf32, #tpu.memory_space<vmem>>, vector<1x128xf32>
    %69 = vector.broadcast %68 : vector<1x128xf32> to vector<8x128xf32>
    %70 = arith.addf %67, %69 : vector<8x128xf32>
    %cst_62 = arith.constant 0.000000e+00 : f32
    %71 = vector.broadcast %cst_62 : f32 to vector<8x128xf32>
    %72 = arith.maximumf %70, %71 : vector<8x128xf32>
    %73 = arith.truncf %72 : vector<8x128xf32> to vector<8x128xbf16>
    %c1_63 = arith.constant 1 : index
    %c0_64 = arith.constant 0 : index
    %74 = vector.load %arg17[%c1_63, %c0_64] : memref<10x128xbf16, #tpu.memory_space<vmem>>, vector<8x128xbf16>
    tpu.vector_store %arg17[%c1_63, %c0_64], %73 {strides = array<i32>} : memref<10x128xbf16, #tpu.memory_space<vmem>>, vector<8x128xbf16>,
    %c0_65 = arith.constant 0 : index
    %c0_66 = arith.constant 0 : index
    %75 = vector.load %arg17[%c0_65, %c0_66] : memref<10x128xbf16, #tpu.memory_space<vmem>>, vector<8x128xbf16>
    %c0_67 = arith.constant 0 : index
    %c0_68 = arith.constant 0 : index
    %c0_69 = arith.constant 0 : index
    %76 = vector.load %arg11[%c0_67, %c0_68, %c0_69] : memref<3x128x128xbf16, #tpu.memory_space<vmem>>, vector<1x128x128xbf16>
    %77 = vector.shape_cast %76 : vector<1x128x128xbf16> to vector<128x128xbf16>
    %cst_70 = arith.constant dense<0.000000e+00> : vector<8x128xf32>
    %78 = tpu.matmul %75, %77, %cst_70 {dimension_numbers = #tpu.dot_dimension_numbers<[1], [0], [0], [1], [0, 0, 1, 1], [], []>} : vector<8x128xbf16>, vector<128x128xbf16>, vector<8x128xf32> -> vector<8x128xf32>
    %c1_71 = arith.constant 1 : index
    %c0_72 = arith.constant 0 : index
    %79 = vector.load %arg17[%c1_71, %c0_72] : memref<10x128xbf16, #tpu.memory_space<vmem>>, vector<8x128xbf16>
    %c1_73 = arith.constant 1 : index
    %c0_74 = arith.constant 0 : index
    %c0_75 = arith.constant 0 : index
    %80 = vector.load %arg11[%c1_73, %c0_74, %c0_75] : memref<3x128x128xbf16, #tpu.memory_space<vmem>>, vector<1x128x128xbf16>
    %81 = vector.shape_cast %80 : vector<1x128x128xbf16> to vector<128x128xbf16>
    %cst_76 = arith.constant dense<0.000000e+00> : vector<8x128xf32>
    %82 = tpu.matmul %79, %81, %cst_76 {dimension_numbers = #tpu.dot_dimension_numbers<[1], [0], [0], [1], [0, 0, 1, 1], [], []>} : vector<8x128xbf16>, vector<128x128xbf16>, vector<8x128xf32> -> vector<8x128xf32>
    %83 = arith.addf %78, %82 : vector<8x128xf32>
    %c2_77 = arith.constant 2 : index
    %c0_78 = arith.constant 0 : index
    %84 = vector.load %arg17[%c2_77, %c0_78] : memref<10x128xbf16, #tpu.memory_space<vmem>>, vector<8x128xbf16>
    %c2_79 = arith.constant 2 : index
    %c0_80 = arith.constant 0 : index
    %c0_81 = arith.constant 0 : index
    %85 = vector.load %arg11[%c2_79, %c0_80, %c0_81] : memref<3x128x128xbf16, #tpu.memory_space<vmem>>, vector<1x128x128xbf16>
    %86 = vector.shape_cast %85 : vector<1x128x128xbf16> to vector<128x128xbf16>
    %cst_82 = arith.constant dense<0.000000e+00> : vector<8x128xf32>
    %87 = tpu.matmul %84, %86, %cst_82 {dimension_numbers = #tpu.dot_dimension_numbers<[1], [0], [0], [1], [0, 0, 1, 1], [], []>} : vector<8x128xbf16>, vector<128x128xbf16>, vector<8x128xf32> -> vector<8x128xf32>
    %88 = arith.addf %83, %87 : vector<8x128xf32>
    %c0_83 = arith.constant 0 : index
    %c0_84 = arith.constant 0 : index
    %89 = vector.load %arg12[%c0_83, %c0_84] : memref<1x128xf32, #tpu.memory_space<vmem>>, vector<1x128xf32>
    %90 = vector.broadcast %89 : vector<1x128xf32> to vector<8x128xf32>
    %91 = arith.mulf %88, %90 : vector<8x128xf32>
    %c0_85 = arith.constant 0 : index
    %c0_86 = arith.constant 0 : index
    %92 = vector.load %arg13[%c0_85, %c0_86] : memref<1x128xf32, #tpu.memory_space<vmem>>, vector<1x128xf32>
    %93 = vector.broadcast %92 : vector<1x128xf32> to vector<8x128xf32>
    %94 = arith.addf %91, %93 : vector<8x128xf32>
    %cst_87 = arith.constant 0.000000e+00 : f32
    %95 = vector.broadcast %cst_87 : f32 to vector<8x128xf32>
    %96 = arith.maximumf %94, %95 : vector<8x128xf32>
    %97 = arith.truncf %96 : vector<8x128xf32> to vector<8x128xbf16>
    %c1_88 = arith.constant 1 : index
    %c0_89 = arith.constant 0 : index
    %98 = vector.load %arg17[%c1_88, %c0_89] : memref<10x128xbf16, #tpu.memory_space<vmem>>, vector<8x128xbf16>
    tpu.vector_store %arg17[%c1_88, %c0_89], %97 {strides = array<i32>} : memref<10x128xbf16, #tpu.memory_space<vmem>>, vector<8x128xbf16>,
    %c0_90 = arith.constant 0 : index
    %c0_91 = arith.constant 0 : index
    %99 = vector.load %arg17[%c0_90, %c0_91] : memref<10x128xbf16, #tpu.memory_space<vmem>>, vector<8x128xbf16>
    %c0_92 = arith.constant 0 : index
    %c0_93 = arith.constant 0 : index
    %c0_94 = arith.constant 0 : index
    %100 = vector.load %arg14[%c0_92, %c0_93, %c0_94] : memref<3x128x128xbf16, #tpu.memory_space<vmem>>, vector<1x128x128xbf16>
    %101 = vector.shape_cast %100 : vector<1x128x128xbf16> to vector<128x128xbf16>
    %cst_95 = arith.constant dense<0.000000e+00> : vector<8x128xf32>
    %102 = tpu.matmul %99, %101, %cst_95 {dimension_numbers = #tpu.dot_dimension_numbers<[1], [0], [0], [1], [0, 0, 1, 1], [], []>} : vector<8x128xbf16>, vector<128x128xbf16>, vector<8x128xf32> -> vector<8x128xf32>
    %c1_96 = arith.constant 1 : index
    %c0_97 = arith.constant 0 : index
    %103 = vector.load %arg17[%c1_96, %c0_97] : memref<10x128xbf16, #tpu.memory_space<vmem>>, vector<8x128xbf16>
    %c1_98 = arith.constant 1 : index
    %c0_99 = arith.constant 0 : index
    %c0_100 = arith.constant 0 : index
    %104 = vector.load %arg14[%c1_98, %c0_99, %c0_100] : memref<3x128x128xbf16, #tpu.memory_space<vmem>>, vector<1x128x128xbf16>
    %105 = vector.shape_cast %104 : vector<1x128x128xbf16> to vector<128x128xbf16>
    %cst_101 = arith.constant dense<0.000000e+00> : vector<8x128xf32>
    %106 = tpu.matmul %103, %105, %cst_101 {dimension_numbers = #tpu.dot_dimension_numbers<[1], [0], [0], [1], [0, 0, 1, 1], [], []>} : vector<8x128xbf16>, vector<128x128xbf16>, vector<8x128xf32> -> vector<8x128xf32>
    %107 = arith.addf %102, %106 : vector<8x128xf32>
    %c2_102 = arith.constant 2 : index
    %c0_103 = arith.constant 0 : index
    %108 = vector.load %arg17[%c2_102, %c0_103] : memref<10x128xbf16, #tpu.memory_space<vmem>>, vector<8x128xbf16>
    %c2_104 = arith.constant 2 : index
    %c0_105 = arith.constant 0 : index
    %c0_106 = arith.constant 0 : index
    %109 = vector.load %arg14[%c2_104, %c0_105, %c0_106] : memref<3x128x128xbf16, #tpu.memory_space<vmem>>, vector<1x128x128xbf16>
    %110 = vector.shape_cast %109 : vector<1x128x128xbf16> to vector<128x128xbf16>
    %cst_107 = arith.constant dense<0.000000e+00> : vector<8x128xf32>
    %111 = tpu.matmul %108, %110, %cst_107 {dimension_numbers = #tpu.dot_dimension_numbers<[1], [0], [0], [1], [0, 0, 1, 1], [], []>} : vector<8x128xbf16>, vector<128x128xbf16>, vector<8x128xf32> -> vector<8x128xf32>
    %112 = arith.addf %107, %111 : vector<8x128xf32>
    %113 = arith.addf %64, %112 : vector<8x128xf32>
    %114 = vector.shape_cast %113 : vector<8x128xf32> to vector<1x8x128xf32>
    %c0_108 = arith.constant 0 : index
    %c0_109 = arith.constant 0 : index
    %c0_110 = arith.constant 0 : index
    %115 = vector.load %arg15[%c0_108, %c0_109, %c0_110] : memref<1x8x128xf32, #tpu.memory_space<vmem>>, vector<1x8x128xf32>
    tpu.vector_store %arg15[%c0_108, %c0_109, %c0_110], %114 {strides = array<i32>} : memref<1x8x128xf32, #tpu.memory_space<vmem>>, vector<1x8x128xf32>,
    return
  }
  func.func @transform_0(%arg0: i32) -> (i32, i32, i32) {
    %c0_i32 = arith.constant 0 : i32
    %c0_i32_0 = arith.constant 0 : i32
    %c0_i32_1 = arith.constant 0 : i32
    return %arg0, %c0_i32, %c0_i32_0 : i32, i32, i32
  }
  func.func @transform_1(%arg0: i32) -> (i32, i32) {
    %c0_i32 = arith.constant 0 : i32
    %c0_i32_0 = arith.constant 0 : i32
    %c0_i32_1 = arith.constant 0 : i32
    return %c0_i32, %c0_i32_0 : i32, i32
  }
  func.func @transform_2(%arg0: i32) -> (i32, i32) {
    %c0_i32 = arith.constant 0 : i32
    %c0_i32_0 = arith.constant 0 : i32
    %c0_i32_1 = arith.constant 0 : i32
    return %c0_i32, %c0_i32_0 : i32, i32
  }
  func.func @transform_3(%arg0: i32) -> (i32, i32) {
    %c0_i32 = arith.constant 0 : i32
    %c0_i32_0 = arith.constant 0 : i32
    %c0_i32_1 = arith.constant 0 : i32
    return %c0_i32, %c0_i32_0 : i32, i32
  }
  func.func @transform_4(%arg0: i32) -> (i32, i32, i32) {
    %c0_i32 = arith.constant 0 : i32
    %c0_i32_0 = arith.constant 0 : i32
    %c0_i32_1 = arith.constant 0 : i32
    %c0_i32_2 = arith.constant 0 : i32
    return %c0_i32, %c0_i32_0, %c0_i32_1 : i32, i32, i32
  }
  func.func @transform_5(%arg0: i32) -> (i32, i32) {
    %c0_i32 = arith.constant 0 : i32
    %c0_i32_0 = arith.constant 0 : i32
    %c0_i32_1 = arith.constant 0 : i32
    return %c0_i32, %c0_i32_0 : i32, i32
  }
  func.func @transform_6(%arg0: i32) -> (i32, i32) {
    %c0_i32 = arith.constant 0 : i32
    %c0_i32_0 = arith.constant 0 : i32
    %c0_i32_1 = arith.constant 0 : i32
    return %c0_i32, %c0_i32_0 : i32, i32
  }
  func.func @transform_7(%arg0: i32) -> (i32, i32, i32) {
    %c0_i32 = arith.constant 0 : i32
    %c0_i32_0 = arith.constant 0 : i32
    %c0_i32_1 = arith.constant 0 : i32
    %c0_i32_2 = arith.constant 0 : i32
    return %c0_i32, %c0_i32_0, %c0_i32_1 : i32, i32, i32
  }
  func.func @transform_8(%arg0: i32) -> (i32, i32) {
    %c0_i32 = arith.constant 0 : i32
    %c0_i32_0 = arith.constant 0 : i32
    %c0_i32_1 = arith.constant 0 : i32
    return %c0_i32, %c0_i32_0 : i32, i32
  }
  func.func @transform_9(%arg0: i32) -> (i32, i32) {
    %c0_i32 = arith.constant 0 : i32
    %c0_i32_0 = arith.constant 0 : i32
    %c0_i32_1 = arith.constant 0 : i32
    return %c0_i32, %c0_i32_0 : i32, i32
  }
  func.func @transform_10(%arg0: i32) -> (i32, i32, i32) {
    %c0_i32 = arith.constant 0 : i32
    %c0_i32_0 = arith.constant 0 : i32
    %c0_i32_1 = arith.constant 0 : i32
    %c0_i32_2 = arith.constant 0 : i32
    return %c0_i32, %c0_i32_0, %c0_i32_1 : i32, i32, i32
  }
  func.func @transform_11(%arg0: i32) -> (i32, i32) {
    %c0_i32 = arith.constant 0 : i32
    %c0_i32_0 = arith.constant 0 : i32
    %c0_i32_1 = arith.constant 0 : i32
    return %c0_i32, %c0_i32_0 : i32, i32
  }
  func.func @transform_12(%arg0: i32) -> (i32, i32) {
    %c0_i32 = arith.constant 0 : i32
    %c0_i32_0 = arith.constant 0 : i32
    %c0_i32_1 = arith.constant 0 : i32
    return %c0_i32, %c0_i32_0 : i32, i32
  }
  func.func @transform_13(%arg0: i32) -> (i32, i32, i32) {
    %c0_i32 = arith.constant 0 : i32
    %c0_i32_0 = arith.constant 0 : i32
    %c0_i32_1 = arith.constant 0 : i32
    %c0_i32_2 = arith.constant 0 : i32
    return %c0_i32, %c0_i32_0, %c0_i32_1 : i32, i32, i32
  }
  func.func @transform_14(%arg0: i32) -> (i32, i32, i32) {
    %c0_i32 = arith.constant 0 : i32
    %c0_i32_0 = arith.constant 0 : i32
    %c0_i32_1 = arith.constant 0 : i32
    return %arg0, %c0_i32, %c0_i32_0 : i32, i32, i32
  }
}

</mosaic_0001>

<bundles_post_ra>
// kernel: network_block_forward.1
= control target key start
LH: loop header
LB: loop body
LE: loop exit
PB: predicated region body
PF: predicated region fallthrough
CT: control target
= control target key end

     0   :  { %19 = vsyncpa [#allocation5], 0  ;;  %s3101_s29 = smov 0   ;;  %s3642_s0 = inlined_call_operand.vmem [shape: f32[2,16,128], index: 0, kind: input, shape index: {}]   ;;  %s3643_s1 = inlined_call_operand.vmem [shape: f32[1,128], index: 1, kind: input, shape index: {}]   ;;  %s3644_s2 = inlined_call_operand.vmem [shape: f32[1,128], index: 2, kind: input, shape index: {}]   ;;  %s3645_s3 = inlined_call_operand.vmem [shape: bf16[24,18], index: 3, kind: input, shape index: {}]   ;;  %s3646_s4 = inlined_call_operand.vmem [shape: bf16[3,128,256], index: 4, kind: input, shape index: {}]   ;;  %s3647_s5 = inlined_call_operand.vmem [shape: f32[1,128], index: 5, kind: input, shape index: {}]   ;;  %s3648_s6 = inlined_call_operand.vmem [shape: f32[1,128], index: 6, kind: input, shape index: {}]   ;;  %s3649_s7 = inlined_call_operand.vmem [shape: bf16[3,128,128], index: 7, kind: input, shape index: {}]   ;;  %s3650_s8 = inlined_call_operand.vmem [shape: f32[1,128], index: 8, kind: input, shape index: {}]   ;;  %s3651_s9 = inlined_call_operand.vmem [shape: f32[1,128], index: 9, kind: input, shape index: {}]   ;;  %s3652_s10 = inlined_call_operand.vmem [shape: bf16[3,128,128], index: 10, kind: input, shape index: {}]   ;;  %s3653_s11 = inlined_call_operand.vmem [shape: f32[1,128], index: 11, kind: input, shape index: {}]   ;;  %s3654_s12 = inlined_call_operand.vmem [shape: f32[1,128], index: 12, kind: input, shape index: {}]   ;;  %s3655_s13 = inlined_call_operand.hbm [shape: bf16[3,128,128], index: 13, kind: input, shape index: {}]   ;;  %s3656_s14 = inlined_call_operand.vmem [shape: f32[2,8,128], index: 14, kind: output, shape index: {}]  }
   0x1 LB: > { %s3107_s30 = sadd.s32 4294967295, %s3018_s29   ;;  %p2247_p0 = scmp.ge.s32.totalorder %s3018_s29, 1  ;;  %s3018_s29 = sphi %s3101_s29, %s25_s29  }
   0x2   : > { %p355_p1 = scmp.lt.s32.totalorder %s3018_s29, 3  ;;  %s3020_s15 = smov [#allocation4]  }
   0x3   : > { %s403_s16 = sshll.u32 %s3020_s15, 4  ;;  %p3657_p3 = scmp.eq.s32.totalorder %s3107_s30, 0  ;;  %s404_s16 = int_to_ptr.vmem [resolvable:$true] %s403_s16 }
   0x4   : > { %p3111_p2 = pnand %p2247_p0, %p355_p1  ;;  %s2980_s21 = scalar_lea.hbm %s3655_s13, 3072 }
   0x5   : > { %p2981_p6 = scmp.ne.s32.totalorder %s3655_s13, %s2980_s21  ;;  %p2987_p10 = scmp.lt.u32.totalorder %s2980_s21, %s3655_s13 }
   0x6   : > { %s3659_s17 = scalar_select %p3111_p2, 1, 0 }
   0x7   : > { %p2806_p4 = pneg %p3111_p2 }
   0x9   : > { %p3120_p5 = pnand %p3657_p3, %p2806_p4 }
   0xb   : > { %p2982_p7 = pneg %p3120_p5 }
   0xd   : > { %p2983_p8 = pnand %p2982_p7, %p2981_p6 }
   0xf   : > { %p2984_p9 = pneg %p2983_p8 }
  0x11   : > { %p2989_p11 = pnand %p2987_p10, %p2984_p9 }
  0x13   : > { %2992 = shalt.err (!%p2989_p11)
}
  0x14   : > { %s2993_s26 = scalar_lea.vmem %s404_s16, 3072  ;;  %p3001_p1 = scmp.lt.s32.totalorder %s404_s16, %s404_s16 }
  0x15   : > { %p2994_p12 = scmp.ne.s32.totalorder %s404_s16, %s2993_s26  ;;  %p3002_p4 = scmp.lt.s32.totalorder %s2993_s26, %s2993_s26 }
  0x17   : > { %p2996_p13 = pnand %p2994_p12, %p2982_p7  ;;  %p3003_p3 = por %p3002_p4, %p3001_p1 }
  0x19   : > { %p2997_p0 = pneg %p2996_p13 }
  0x1b   : > { %p3004_p2 = pnand %p3003_p3, %p2997_p0 }
  0x1d   : > { %3007 = shalt.err (!%p3004_p2)
}
  0x1e   : > { %s3021_s27 = smov 64   ;;  %s3022_s28 = smov 4  }
  0x1f   : > { %2809 = dma.hbm_to_vmem [thread:$0]  (!%p3120_p5), %s3655_s13, 3072, %s404_s16, [#allocation5], %s3021_s27, %s3021_s27, %s3022_s28  }
  0x20   : > { %p3661_p6 = scmp.ne.s32.totalorder %s3659_s17, 0 }
  0x21   : > { %p3662_p8 = scmp.eq.s32.totalorder (!%p3661_p6), %s3107_s30, 0 }
  0x22   : > { %427 = sbr.rel (%p3661_p6) target bundleno = 1502 (0x5de), region = 76 }
  0x29   : > { %3013 = dma.done.wait (%p3662_p8), [#allocation5], 3072   ;;  %p3663_p7 = pmov %p3662_p8 }
  0x2a   : > { %p472_p2 = scmp.lt.s32.totalorder %s3107_s30, 1  ;;  %vm482_vm0 = vcmask 1040384   ;;  %vm483_vm1 = vsmask.f32 256  ;;  %vm488_vm2 = vsmask.f32 7938 }
  0x2b   : > { %3015 = vsyncadd (%p3663_p7), [#allocation5], 4294964224  ;;  %v485_v2 = vld [vmem:[#allocation2] sm:$0x1]  ;;  %vm581_vm5 = vcmask 146432   ;;  %vm549_vm7 = vcmask 1043456  }
  0x2c   : > { %s3673_s30 = smov (!%p472_p2, %s3107_s30), 1  ;;  %vm3156_vm3 = vmand %vm482_vm0, %vm483_vm1  ;;  %v2255_v6 = vld [vmem:[%s3643_s1] ss:$0 sm:$0xff]  ;;  %v490_v11 = vld [vmem:[#allocation2 + $0x8] sm:$0x1]  ;;  %v3023_v57 = vmov 0  }
  0x2d   : > { %s2498_s18 = sshll.u32 %s3673_s30, 4  ;;  %vm3162_vm4 = vmand %vm482_vm0, %vm488_vm2  ;;  %v486_v5 = vsel %vm3156_vm3, 0, %v485_v2  ;;  %v2256_v7 = vld [vmem:[%s3644_s2] ss:$0 sm:$0xff]  ;;  %v2830_v15 = vld [vmem:[%s3646_s4 + $0x84] ss:$8 sps:$4 sm:$0xff]   ;;  %790 = vmatprep.mubr.bf16.mxu1 %v3023_v57 }
  0x2e   : > { %s476_s17 = scalar_lea.vmem %s3642_s0, %s2498_s18  ;;  %v2828_v8 = vld [vmem:[%s3645_s3] sm:$0xff]   ;;  %487 = vst [vmem:[#allocation2] sm:$0x1] %v486_v5  ;;  %v491_v12 = vsel %vm3162_vm4, 0, %v490_v11  ;;  %v2833_v17 = vld [vmem:[%s3646_s4 + $0x94] ss:$8 sps:$4 sm:$0xff]   ;;  %758 = vmatprep.subr.bf16.mxu1 %v2830_v15  ;;  %vm3201_vm9 = vmand %vm549_vm7, %vm488_vm2 }
  0x2f   : > { %v499_v3 = vld [vmem:[%s476_s17] sm:$0xff]  ;;  %v500_v4 = vld [vmem:[%s476_s17 + $0x8] sm:$0xff]  ;;  %2593 = vmatprep.mubr.msk.bf16.mxu0 %vm581_vm5, %v2828_v8  ;;  %492 = vst [vmem:[#allocation2 + $0x8] sm:$0x1] %v491_v12  ;;  %vm527_vm6 = vsmask.f32 4368 }
  0x30   : > { %v508_v9 = vmul.f32 %v2255_v6, %v499_v3  ;;  %v509_v10 = vmul.f32 %v2255_v6, %v500_v4  ;;  %v2832_v16 = vld [vmem:[%s3646_s4 + $0x80] ss:$8 sps:$4 sm:$0xff]   ;;  %v2835_v20 = vld [vmem:[%s3646_s4 + $0x90] ss:$8 sps:$4 sm:$0xff]   ;;  %v2836_v23 = vld [vmem:[%s3646_s4 + $0xa4] ss:$8 sps:$4 sm:$0xff]  }
  0x31   : > { %759 = vmatpush1.bf16.msra.mxu1 %v2832_v16  ;;  %vm3196_vm8 = vmor %vm483_vm1, %vm527_vm6  ;;  %v2838_v30 = vld [vmem:[%s3646_s4 + $0xa0] ss:$8 sps:$4 sm:$0xff]   ;;  %v2839_v33 = vld [vmem:[%s3646_s4 + $0xb4] ss:$8 sps:$4 sm:$0xff]   ;;  %v3024_v60 = vmov 0.0   ;;  %vm3025_vm10 = vmmov 0  }
  0x32   : > { %v517_v13 = vadd.f32 %v2256_v7, %v508_v9  ;;  %v518_v14 = vadd.f32 %v2256_v7, %v509_v10  ;;  %760 = vmatprep.subr.bf16.mxu1 %v2833_v17  ;;  %v2841_v36 = vld [vmem:[%s3646_s4 + $0xb0] ss:$8 sps:$4 sm:$0xff]   ;;  %v2842_v41 = vld [vmem:[%s3646_s4 + $0xc4] ss:$8 sps:$4 sm:$0xff]   ;;  %v2844_v45 = vld [vmem:[%s3646_s4 + $0xc0] ss:$8 sps:$4 sm:$0xff]  }
  0x33   : > { %v2845_v46 = vld [vmem:[%s3646_s4 + $0xd4] ss:$8 sps:$4 sm:$0xff]   ;;  %v2847_v47 = vld [vmem:[%s3646_s4 + $0xd0] ss:$8 sps:$4 sm:$0xff]   ;;  %v2848_v48 = vld [vmem:[%s3646_s4 + $0xe4] ss:$8 sps:$4 sm:$0xff]  }
  0x34   : > { %v519_v18 = vmax.f32 %v517_v13, 0.0  ;;  %v520_v19 = vmax.f32 %v518_v14, 0.0  ;;  %v2829_v52 = vld [vmem:[%s3645_s3 + $0x8] ss:$0 sps:$4 sm:$0xff]   ;;  %v2851_v54 = vld [vmem:[%s3646_s4 + $0xf4] ss:$8 sps:$4 sm:$0xff]  }
  0x35   : > { %761 = vmatpush1.bf16.msra.mxu1 %v2835_v20  ;;  %v551_v34 = vld [vmem:[#allocation2] sm:$0xf]  ;;  %v2853_v55 = vld [vmem:[%s3646_s4 + $0xf0] ss:$8 sps:$4 sm:$0xff]   ;;  %v2856_v56 = vld [vmem:[%s3646_s4 + $0x4] ss:$8 sps:$4 sm:$0xff]  }
  0x36   : > { %v2499_v21 = vpack.c.bf16 %v519_v18, %v519_v18  ;;  %v2500_v22 = vpack.c.bf16 %v520_v19, %v520_v19  ;;  %762 = vmatprep.subr.bf16.mxu1 %v2836_v23  ;;  %v555_v35 = vld [vmem:[#allocation2 + $0x8] sm:$0x1]  ;;  %v493_v58 = vld [vmem:[#allocation3] sm:$0x1]  ;;  %v496_v59 = vld [vmem:[#allocation3 + $0x4] sm:$0x1] }
  0x37   : > { %v2850_v53 = vld [vmem:[%s3646_s4 + $0xe0] ss:$8 sps:$4 sm:$0xff]   ;;  %v494_v61 = vsel %vm3156_vm3, 0, %v493_v58  ;;  %v497_v62 = vsel %vm3162_vm4, 0, %v496_v59  ;;  %v2859_v8 = vld [vmem:[%s3646_s4 + $0x14] ss:$8 sps:$4 sm:$0xff]  }
  0x38   : > { %v530_v25 = vshrl.u32 %v2499_v21, 16  ;;  %v533_v26 = vshll.u32 %v2499_v21, 16  ;;  %v538_v27 = vshrl.u32 %v2500_v22, 16  ;;  %v541_v28 = vshll.u32 %v2500_v22, 16  ;;  %495 = vst [vmem:[#allocation3] sm:$0x1] %v494_v61 }
  0x39   : > { %763 = vmatpush1.bf16.msra.mxu1 %v2838_v30  ;;  %498 = vst [vmem:[#allocation3 + $0x4] sm:$0x1] %v497_v62  ;;  %v2854_v6 = vld [vmem:[%s3646_s4] ss:$8 sps:$4 sm:$0xff]   ;;  %v2857_v1 = vld [vmem:[%s3646_s4 + $0x10] ss:$8 sps:$4 sm:$0xff]  }
  0x3a   : > { %v532_v31 = vrot.slane %v530_v25, 7  ;;  %v540_v32 = vrot.slane %v538_v27, 7  ;;  %764 = vmatprep.subr.bf16.mxu1 %v2839_v33  ;;  %v2862_v9 = vld [vmem:[%s3646_s4 + $0x24] ss:$8 sps:$4 sm:$0xff]   ;;  %v2860_v10 = vld [vmem:[%s3646_s4 + $0x20] ss:$8 sps:$4 sm:$0xff]  }
  0x3b   : > { %v2865_v11 = vld [vmem:[%s3646_s4 + $0x34] ss:$8 sps:$4 sm:$0xff]   ;;  %v2863_v12 = vld [vmem:[%s3646_s4 + $0x30] ss:$8 sps:$4 sm:$0xff]   ;;  %v2868_v13 = vld [vmem:[%s3646_s4 + $0x44] ss:$8 sps:$4 sm:$0xff]  }
  0x3c   : > { %v535_v37 = vor.u32 %v533_v26, %v532_v31  ;;  %v536_v38 = vrot.slane %v532_v31, 4  ;;  %v543_v39 = vor.u32 %v541_v28, %v540_v32  ;;  %v545_v40 = vrot.slane %v540_v32, 4  ;;  %v2866_v14 = vld [vmem:[%s3646_s4 + $0x40] ss:$8 sps:$4 sm:$0xff]   ;;  %v2871_v15 = vld [vmem:[%s3646_s4 + $0x54] ss:$8 sps:$4 sm:$0xff]  }
  0x3d   : > { %765 = vmatpush1.bf16.msra.mxu1 %v2841_v36  ;;  %v2869_v16 = vld [vmem:[%s3646_s4 + $0x50] ss:$8 sps:$4 sm:$0xff]   ;;  %v2874_v17 = vld [vmem:[%s3646_s4 + $0x64] ss:$8 sps:$4 sm:$0xff]   ;;  %v2872_v18 = vld [vmem:[%s3646_s4 + $0x60] ss:$8 sps:$4 sm:$0xff]  }
  0x3e   : > { %v544_v42 = vsel %vm3196_vm8, %v536_v38, %v543_v39  ;;  %v552_v43 = vsel %vm3201_vm9, %v535_v37, %v551_v34  ;;  %v556_v44 = vsel %vm3156_vm3, %v545_v40, %v555_v35  ;;  %766 = vmatprep.subr.bf16.mxu1 %v2842_v41  ;;  %v2877_v19 = vld [vmem:[%s3646_s4 + $0x74] ss:$8 sps:$4 sm:$0xff]   ;;  %v2875_v20 = vld [vmem:[%s3646_s4 + $0x70] ss:$8 sps:$4 sm:$0xff]   ;;  %v2880_v21 = vld [vmem:[%s3646_s4 + $0x104] ss:$8 sps:$4 sm:$0xff]  }
  0x3f   : > { %553 = vst [vmem:[#allocation2] sm:$0xf] %v552_v43  ;;  %554 = vst [vmem:[#allocation2 + $0x4] sm:$0xf] %v544_v42  ;;  %v2878_v22 = vld [vmem:[%s3646_s4 + $0x100] ss:$8 sps:$4 sm:$0xff]  }
  0x40   : > { %557 = vst [vmem:[#allocation2 + $0x8] sm:$0x1] %v556_v44  ;;  %v2883_v23 = vld [vmem:[%s3646_s4 + $0x114] ss:$8 sps:$4 sm:$0xff]   ;;  %v2881_v24 = vld [vmem:[%s3646_s4 + $0x110] ss:$8 sps:$4 sm:$0xff]  }
  0x41   : > { %767 = vmatpush1.bf16.msra.mxu1 %v2844_v45  ;;  %v2886_v25 = vld [vmem:[%s3646_s4 + $0x124] ss:$8 sps:$4 sm:$0xff]   ;;  %v2884_v26 = vld [vmem:[%s3646_s4 + $0x120] ss:$8 sps:$4 sm:$0xff]   ;;  %v2889_v27 = vld [vmem:[%s3646_s4 + $0x134] ss:$8 sps:$4 sm:$0xff]  }
  0x42   : > { %768 = vmatprep.subr.bf16.mxu1 %v2845_v46  ;;  %v2887_v28 = vld [vmem:[%s3646_s4 + $0x130] ss:$8 sps:$4 sm:$0xff]   ;;  %v2892_v30 = vld [vmem:[%s3646_s4 + $0x144] ss:$8 sps:$4 sm:$0xff]   ;;  %v2890_v31 = vld [vmem:[%s3646_s4 + $0x140] ss:$8 sps:$4 sm:$0xff]  }
  0x43   : > { %v2895_v32 = vld [vmem:[%s3646_s4 + $0x154] ss:$8 sps:$4 sm:$0xff]   ;;  %v2893_v33 = vld [vmem:[%s3646_s4 + $0x150] ss:$8 sps:$4 sm:$0xff]   ;;  %v2898_v34 = vld [vmem:[%s3646_s4 + $0x164] ss:$8 sps:$4 sm:$0xff]  }
  0x44   : > { %v2896_v35 = vld [vmem:[%s3646_s4 + $0x160] ss:$8 sps:$4 sm:$0xff]   ;;  %v2901_v36 = vld [vmem:[%s3646_s4 + $0x174] ss:$8 sps:$4 sm:$0xff]   ;;  %v2899_v37 = vld [vmem:[%s3646_s4 + $0x170] ss:$8 sps:$4 sm:$0xff]  }
  0x45   : > { %769 = vmatpush1.bf16.msra.mxu1 %v2847_v47  ;;  %v2902_v39 = vld [vmem:[%s3649_s7 + $0x40] sm:$0xff]   ;;  %v2903_v40 = vld [vmem:[%s3649_s7 + $0x48] sm:$0xff]   ;;  %v2904_v41 = vld [vmem:[%s3649_s7 + $0x50] sm:$0xff]   ;;  %s2254_s23 = sshll.u32 %s3673_s30, 3 }
  0x46   : > { %v2826_v49 = vld [vmem:[#allocation2] sm:$0xff]   ;;  %770 = vmatprep.subr.bf16.mxu1 %v2848_v48  ;;  %v2905_v42 = vld [vmem:[%s3649_s7 + $0x58] sm:$0xff]   ;;  %v2907_v44 = vld [vmem:[%s3649_s7 + $0x68] sm:$0xff]   ;;  %s480_s26 = scalar_lea.vmem %s3656_s14, %s2254_s23 }
  0x47   : > { %v2827_v50 = vld [vmem:[#allocation2 + $0x8] ss:$0 sps:$4 sm:$0x11]   ;;  %2589 = vmatprep.subr.bf16.mxu0 %v2826_v49  ;;  %v2906_v43 = vld [vmem:[%s3649_s7 + $0x60] sm:$0xff]   ;;  %v2908_v45 = vld [vmem:[%s3649_s7 + $0x70] sm:$0xff]  }
  0x48   : > { %2590 = vmatpush3.bf16.msra.mxu0 %v2826_v49  ;;  %v590_v51 = vsel %vm482_vm0, %v2827_v50, 0  ;;  %v2909_v46 = vld [vmem:[%s3649_s7 + $0x78] sm:$0xff]   ;;  %v2345_v47 = vld [vmem:[%s3647_s5] ss:$0 sm:$0xff]  ;;  %v1091_v61 = vld [vmem:[#allocation3] sm:$0xf] }
  0x49   : > { %2801 = vmatprep.subr.msk.bf16.mxu0 %vm482_vm0, %v2827_v50  ;;  %771 = vmatpush1.bf16.msra.mxu1 %v2850_v53  ;;  %v2346_v49 = vld [vmem:[%s3648_s6] ss:$0 sm:$0xff]  ;;  %v1094_v62 = vld [vmem:[#allocation3 + $0x4] sm:$0x1]  ;;  %v2965_v0 = vld [vmem:[#allocation4 + $0x10] sm:$0xff]  }
  0x4a   : > { %772 = vmatprep.subr.bf16.mxu1 %v2851_v54  ;;  %v2966_v29 = vld [vmem:[#allocation4 + $0x18] sm:$0xff]  }
  0x4c   : > { %2592 = vmatpush3.bf16.msra.mxu0 %v590_v51 }
  0x4d   : > { %773 = vmatpush1.bf16.msra.mxu1 %v2853_v55  ;;  %2597 = vmatprep.subr.bf16.mxu0 %v3024_v60 }
  0x4e   : > { %879 = vmatprep.subr.bf16.mxu1 %v2856_v56 }
  0x4f   : > { %2594 = vmatmul.mubr.msk.bf16.vlgmr.msra.gmra.mrb[0].mxu0 %vm581_vm5, %v2829_v52 }
  0x50   : > { %2598 = vmatpush3.bf16.msra.mxu0 %v2902_v39  ;;  %2613 = vmatprep.mubr.msk.bf16.mxu0 %vm3025_vm10, %v3024_v60 }
  0x51   : > { %2599 = vmatprep.subr.bf16.mxu0 %v3024_v60 }
  0x54   : > { %2600 = vmatpush3.bf16.msra.mxu0 %v2903_v40  ;;  %v2406_v40 = vld [vmem:[%s3650_s8] ss:$0 sm:$0xff] }
  0x55   : > { %2601 = vmatprep.subr.bf16.mxu0 %v3024_v60 }
  0x58   : > { %2602 = vmatpush3.bf16.msra.mxu0 %v2904_v41 }
  0x59   : > { %2603 = vmatprep.subr.bf16.mxu0 %v3024_v60 }
  0x5c   : > { %2604 = vmatpush3.bf16.msra.mxu0 %v2905_v42 }
  0x5d   : > { %2605 = vmatprep.subr.bf16.mxu0 %v3024_v60 }
  0x60   : > { %2606 = vmatpush3.bf16.msra.mxu0 %v2906_v43  ;;  %v2407_v43 = vld [vmem:[%s3651_s9] ss:$0 sm:$0xff] }
  0x61   : > { %2607 = vmatprep.subr.bf16.mxu0 %v3024_v60 }
  0x64   : > { %2608 = vmatpush3.bf16.msra.mxu0 %v2907_v44 }
  0x65   : > { %2609 = vmatprep.subr.bf16.mxu0 %v3024_v60 }
  0x68   : > { %2610 = vmatpush3.bf16.msra.mxu0 %v2908_v45 }
  0x69   : > { %2611 = vmatprep.subr.bf16.mxu0 %v3024_v60 }
  0x6c   : > { %2612 = vmatpush3.bf16.msra.mxu0 %v2909_v46 }
  0x6d   : > { %2617 = vmatprep.subr.bf16.mxu0 %v3024_v60 }
 0x122   : > { %v3258_v63 = vpop.f32.mrb[0].mxu0 }
 0x123   : > { %v626_v2 = vpop.f32.mrb[1].mxu0  ;;  %v641_v38 = vpack.c.bf16 %v3258_v63, %v3258_v63 }
 0x124   : > { %v2596_v3 = vpop.f32.mrb[2].mxu0 }
 0x125   : > { %v629_v4 = vpop.f32.mrb[3].mxu0 }
 0x126   : > { %v640_v5 = vpack.c.bf16 %v629_v4, %v626_v2 }
 0x128   : > { %v676_v7 = vrot.slane %v640_v5, 4 }
 0x12a   : > { %791 = vmatmul.mubr.bf16.vlgmr.msra.gmra.mrb[0].mxu1 %v676_v7 }
 0x12b   : > { %880 = vmatpush1.bf16.msra.mxu1 %v2854_v6  ;;  %911 = vmatprep.mubr.bf16.mxu1 %v3023_v57 }
 0x12c   : > { %881 = vmatprep.subr.bf16.mxu1 %v2859_v8 }
 0x12f   : > { %882 = vmatpush1.bf16.msra.mxu1 %v2857_v1 }
 0x130   : > { %883 = vmatprep.subr.bf16.mxu1 %v2862_v9 }
 0x133   : > { %884 = vmatpush1.bf16.msra.mxu1 %v2860_v10  ;;  %v2911_v10 = vld [vmem:[%s3649_s7] sm:$0xff]  }
 0x134   : > { %885 = vmatprep.subr.bf16.mxu1 %v2865_v11 }
 0x137   : > { %886 = vmatpush1.bf16.msra.mxu1 %v2863_v12  ;;  %v2912_v12 = vld [vmem:[%s3649_s7 + $0x8] sm:$0xff]  }
 0x138   : > { %887 = vmatprep.subr.bf16.mxu1 %v2868_v13  ;;  %v2913_v13 = vld [vmem:[%s3649_s7 + $0x10] sm:$0xff]  }
 0x13b   : > { %888 = vmatpush1.bf16.msra.mxu1 %v2866_v14  ;;  %v2914_v14 = vld [vmem:[%s3649_s7 + $0x18] sm:$0xff]  }
 0x13c   : > { %889 = vmatprep.subr.bf16.mxu1 %v2871_v15  ;;  %v2915_v15 = vld [vmem:[%s3649_s7 + $0x20] sm:$0xff]  }
 0x13f   : > { %890 = vmatpush1.bf16.msra.mxu1 %v2869_v16  ;;  %v2916_v16 = vld [vmem:[%s3649_s7 + $0x28] sm:$0xff]  }
 0x140   : > { %891 = vmatprep.subr.bf16.mxu1 %v2874_v17  ;;  %v2917_v17 = vld [vmem:[%s3649_s7 + $0x30] sm:$0xff]  }
 0x143   : > { %892 = vmatpush1.bf16.msra.mxu1 %v2872_v18  ;;  %v2918_v18 = vld [vmem:[%s3649_s7 + $0x38] sm:$0xff]  }
 0x144   : > { %893 = vmatprep.subr.bf16.mxu1 %v2877_v19  ;;  %v2919_v19 = vld [vmem:[%s3649_s7 + $0x80] sm:$0xff]  }
 0x147   : > { %894 = vmatpush1.bf16.msra.mxu1 %v2875_v20  ;;  %v2920_v20 = vld [vmem:[%s3649_s7 + $0x88] sm:$0xff]  }
 0x148   : > { %1017 = vmatprep.subr.bf16.mxu1 %v2880_v21  ;;  %v2921_v21 = vld [vmem:[%s3649_s7 + $0x90] sm:$0xff]  }
 0x14a   : > { %912 = vmatmul.mubr.bf16.vlgmr.msra.gmra.mrb[0].mxu1 %v640_v5 }
 0x14b   : > { %1018 = vmatpush1.bf16.msra.mxu1 %v2878_v22  ;;  %1049 = vmatprep.mubr.bf16.mxu1 %v3023_v57  ;;  %v2922_v22 = vld [vmem:[%s3649_s7 + $0x98] sm:$0xff]  }
 0x14c   : > { %1019 = vmatprep.subr.bf16.mxu1 %v2883_v23  ;;  %v2923_v23 = vld [vmem:[%s3649_s7 + $0xa0] sm:$0xff]  }
 0x14f   : > { %1020 = vmatpush1.bf16.msra.mxu1 %v2881_v24  ;;  %v2924_v24 = vld [vmem:[%s3649_s7 + $0xa8] sm:$0xff]  }
 0x150   : > { %1021 = vmatprep.subr.bf16.mxu1 %v2886_v25  ;;  %v2925_v25 = vld [vmem:[%s3649_s7 + $0xb0] sm:$0xff]  }
 0x153   : > { %1022 = vmatpush1.bf16.msra.mxu1 %v2884_v26 }
 0x154   : > { %1023 = vmatprep.subr.bf16.mxu1 %v2889_v27  ;;  %v2926_v27 = vld [vmem:[%s3649_s7 + $0xb8] sm:$0xff]  }
 0x157   : > { %1024 = vmatpush1.bf16.msra.mxu1 %v2887_v28 }
 0x158   : > { %1025 = vmatprep.subr.bf16.mxu1 %v2892_v30 }
 0x15b   : > { %1026 = vmatpush1.bf16.msra.mxu1 %v2890_v31  ;;  %v2928_v31 = vld [vmem:[%s3652_s10 + $0x40] sm:$0xff]  }
 0x15c   : > { %1027 = vmatprep.subr.bf16.mxu1 %v2895_v32  ;;  %v2929_v32 = vld [vmem:[%s3652_s10 + $0x48] sm:$0xff]  }
 0x15f   : > { %1028 = vmatpush1.bf16.msra.mxu1 %v2893_v33  ;;  %v2930_v33 = vld [vmem:[%s3652_s10 + $0x50] sm:$0xff]  }
 0x160   : > { %1029 = vmatprep.subr.bf16.mxu1 %v2898_v34  ;;  %v2931_v34 = vld [vmem:[%s3652_s10 + $0x58] sm:$0xff]  }
 0x163   : > { %1030 = vmatpush1.bf16.msra.mxu1 %v2896_v35  ;;  %v2932_v35 = vld [vmem:[%s3652_s10 + $0x60] sm:$0xff]  }
 0x164   : > { %1031 = vmatprep.subr.bf16.mxu1 %v2901_v36  ;;  %v2933_v36 = vld [vmem:[%s3652_s10 + $0x68] sm:$0xff]  }
 0x167   : > { %1032 = vmatpush1.bf16.msra.mxu1 %v2899_v37  ;;  %v2934_v37 = vld [vmem:[%s3652_s10 + $0x70] sm:$0xff]  }
 0x168   : > { %2657 = vmatprep.subr.bf16.mxu1 %v3024_v60 }
 0x16a   : > { %1050 = vmatmul.mubr.bf16.vlgmr.msra.gmra.mrb[0].mxu1 %v641_v38  ;;  %v2935_v38 = vld [vmem:[%s3652_s10 + $0x78] sm:$0xff]  }
 0x16b   : > { %2673 = vmatprep.mubr.msk.bf16.mxu1 %vm3025_vm10, %v3024_v60  ;;  %2658 = vmatpush3.bf16.msra.mxu1 %v2928_v31  ;;  %v2467_v31 = vld [vmem:[%s3653_s11] ss:$0 sm:$0xff] }
 0x16c   : > { %2659 = vmatprep.subr.bf16.mxu1 %v3024_v60 }
 0x16f   : > { %2660 = vmatpush3.bf16.msra.mxu1 %v2929_v32 }
 0x170   : > { %2661 = vmatprep.subr.bf16.mxu1 %v3024_v60 }
 0x173   : > { %2662 = vmatpush3.bf16.msra.mxu1 %v2930_v33  ;;  %v2468_v33 = vld [vmem:[%s3654_s12] ss:$0 sm:$0xff] }
 0x174   : > { %2663 = vmatprep.subr.bf16.mxu1 %v3024_v60 }
 0x177   : > { %2664 = vmatpush3.bf16.msra.mxu1 %v2931_v34 }
 0x178   : > { %2665 = vmatprep.subr.bf16.mxu1 %v3024_v60 }
 0x17b   : > { %2666 = vmatpush3.bf16.msra.mxu1 %v2932_v35 }
 0x17c   : > { %2667 = vmatprep.subr.bf16.mxu1 %v3024_v60 }
 0x17f   : > { %2668 = vmatpush3.bf16.msra.mxu1 %v2933_v36 }
 0x180   : > { %2669 = vmatprep.subr.bf16.mxu1 %v3024_v60 }
 0x183   : > { %2670 = vmatpush3.bf16.msra.mxu1 %v2934_v37 }
 0x184   : > { %2671 = vmatprep.subr.bf16.mxu1 %v3024_v60 }
 0x187   : > { %2672 = vmatpush3.bf16.msra.mxu1 %v2935_v38 }
 0x188   : > { %2677 = vmatprep.subr.bf16.mxu1 %v3024_v60 }
 0x23d   : > { %v1051_v48 = vpop.f32.mrb[0].mxu1 }
 0x23e   : > { %v1067_v50 = vmul.f32 %v2345_v47, %v1051_v48  ;;  %v3398_v51 = vpop.f32.mrb[1].mxu1 }
 0x23f   : > { %v1055_v52 = vpop.f32.mrb[2].mxu1 }
 0x240   : > { %v1075_v53 = vadd.f32 %v2346_v49, %v1067_v50  ;;  %v1056_v54 = vpop.f32.mrb[3].mxu1 }
 0x242   : > { %v1076_v55 = vmax.f32 %v1075_v53, 0.0 }
 0x244   : > { %v2501_v56 = vpack.c.bf16 %v1076_v55, %v1076_v55 }
 0x246   : > { %v1082_v57 = vshrl.u32 %v2501_v56, 16  ;;  %v1085_v59 = vshll.u32 %v2501_v56, 16 }
 0x248   : > { %v1084_v58 = vrot.slane %v1082_v57, 7 }
 0x24a   : > { %v1087_v63 = vor.u32 %v1085_v59, %v1084_v58  ;;  %v1088_v2 = vrot.slane %v1084_v58, 4 }
 0x24c   : > { %v1092_v3 = vsel %vm3201_vm9, %v1087_v63, %v1091_v61  ;;  %v1095_v4 = vsel %vm3156_vm3, %v1088_v2, %v1094_v62 }
 0x24d   : > { %1093 = vst [vmem:[#allocation3] sm:$0xf] %v1092_v3  ;;  %1096 = vst [vmem:[#allocation3 + $0x4] sm:$0x1] %v1095_v4  ;;  %v2937_v3 = vld [vmem:[%s3652_s10] sm:$0xff]  }
 0x254   : > { %v3404_v5 = vld [vmem:[#allocation3] sm:$0xf]  ;;  %v1114_v6 = vld [vmem:[#allocation3 + $0x4] sm:$0x1] }
 0x255   : > { %v2364_v7 = vcombine.low %v3404_v5, %v1114_v6  ;;  %v1321_v26 = vld [vmem:[#allocation3] sm:$0xe]  ;;  %v1467_v56 = vld [vmem:[#allocation3 + $0x4] sm:$0x1] }
 0x256   : > { %v2397_v28 = vcombine.low %v1321_v26, %v1114_v6  ;;  %v2939_v6 = vld [vmem:[%s3652_s10 + $0x10] sm:$0xff]  }
 0x257   : > { %v1140_v8 = vshll.u32 %v2364_v7, 16  ;;  %v1138_v1 = vshrl.u32 %v2364_v7, 16  ;;  %v2940_v7 = vld [vmem:[%s3652_s10 + $0x18] sm:$0xff]  }
 0x258   : > { %v1342_v30 = vrot.slane %v2397_v28, 1  ;;  %v2958_v26 = vld [vmem:[#allocation4 + $0x60] sm:$0xff]   ;;  %v2960_v28 = vld [vmem:[#allocation4 + $0x70] sm:$0xff]  }
 0x259   : > { %v1142_v9 = vrot.slane %v1140_v8, 1  ;;  %v2941_v8 = vld [vmem:[%s3652_s10 + $0x20] sm:$0xff]  }
 0x25b   : > { %v1143_v11 = vor.u32 %v1142_v9, %v1138_v1  ;;  %v2942_v1 = vld [vmem:[%s3652_s10 + $0x28] sm:$0xff]   ;;  %v2943_v9 = vld [vmem:[%s3652_s10 + $0x30] sm:$0xff]  }
 0x25d   : > { %2614 = vmatmul.mubr.bf16.vlgmr.msra.gmra.mrb[4].mxu0 %v1143_v11  ;;  %v2945_v11 = vld [vmem:[%s3652_s10 + $0x80] sm:$0xff]  }
 0x25e   : > { %2618 = vmatpush3.bf16.msra.mxu0 %v2911_v10  ;;  %2633 = vmatprep.mubr.msk.bf16.mxu0 %vm3025_vm10, %v3024_v60  ;;  %v2944_v10 = vld [vmem:[%s3652_s10 + $0x38] sm:$0xff]  }
 0x25f   : > { %2619 = vmatprep.subr.bf16.mxu0 %v3024_v60 }
 0x262   : > { %2620 = vmatpush3.bf16.msra.mxu0 %v2912_v12  ;;  %v2946_v12 = vld [vmem:[%s3652_s10 + $0x88] sm:$0xff]  }
 0x263   : > { %2621 = vmatprep.subr.bf16.mxu0 %v3024_v60 }
 0x266   : > { %2622 = vmatpush3.bf16.msra.mxu0 %v2913_v13  ;;  %v2947_v13 = vld [vmem:[%s3652_s10 + $0x90] sm:$0xff]  }
 0x267   : > { %2623 = vmatprep.subr.bf16.mxu0 %v3024_v60 }
 0x26a   : > { %2624 = vmatpush3.bf16.msra.mxu0 %v2914_v14  ;;  %v2948_v14 = vld [vmem:[%s3652_s10 + $0x98] sm:$0xff]  }
 0x26b   : > { %2625 = vmatprep.subr.bf16.mxu0 %v3024_v60 }
 0x26e   : > { %2626 = vmatpush3.bf16.msra.mxu0 %v2915_v15  ;;  %v2949_v15 = vld [vmem:[%s3652_s10 + $0xa0] sm:$0xff]  }
 0x26f   : > { %2627 = vmatprep.subr.bf16.mxu0 %v3024_v60 }
 0x272   : > { %2628 = vmatpush3.bf16.msra.mxu0 %v2916_v16  ;;  %v2950_v16 = vld [vmem:[%s3652_s10 + $0xa8] sm:$0xff]  }
 0x273   : > { %2629 = vmatprep.subr.bf16.mxu0 %v3024_v60 }
 0x276   : > { %2630 = vmatpush3.bf16.msra.mxu0 %v2917_v17  ;;  %v2951_v17 = vld [vmem:[%s3652_s10 + $0xb0] sm:$0xff]  }
 0x277   : > { %2631 = vmatprep.subr.bf16.mxu0 %v3024_v60 }
 0x27a   : > { %2632 = vmatpush3.bf16.msra.mxu0 %v2918_v18 }
 0x27b   : > { %2637 = vmatprep.subr.bf16.mxu0 %v3024_v60 }
 0x27d   : > { %2634 = vmatmul.mubr.bf16.vlgmr.msra.gmra.mrb[4].mxu0 %v3404_v5 }
 0x27e   : > { %2638 = vmatpush3.bf16.msra.mxu0 %v2919_v19  ;;  %2653 = vmatprep.mubr.msk.bf16.mxu0 %vm3025_vm10, %v3024_v60  ;;  %v2952_v19 = vld [vmem:[%s3652_s10 + $0xb8] sm:$0xff]  }
 0x27f   : > { %2639 = vmatprep.subr.bf16.mxu0 %v3024_v60 }
 0x282   : > { %2640 = vmatpush3.bf16.msra.mxu0 %v2920_v20 }
 0x283   : > { %2641 = vmatprep.subr.bf16.mxu0 %v3024_v60 }
 0x286   : > { %2642 = vmatpush3.bf16.msra.mxu0 %v2921_v21 }
 0x287   : > { %2643 = vmatprep.subr.bf16.mxu0 %v3024_v60 }
 0x28a   : > { %2644 = vmatpush3.bf16.msra.mxu0 %v2922_v22  ;;  %v2954_v22 = vld [vmem:[#allocation4 + $0x40] sm:$0xff]  }
 0x28b   : > { %2645 = vmatprep.subr.bf16.mxu0 %v3024_v60 }
 0x28e   : > { %2646 = vmatpush3.bf16.msra.mxu0 %v2923_v23  ;;  %v2955_v23 = vld [vmem:[#allocation4 + $0x48] sm:$0xff]  }
 0x28f   : > { %2647 = vmatprep.subr.bf16.mxu0 %v3024_v60 }
 0x292   : > { %2648 = vmatpush3.bf16.msra.mxu0 %v2924_v24  ;;  %v2956_v24 = vld [vmem:[#allocation4 + $0x50] sm:$0xff]  }
 0x293   : > { %2649 = vmatprep.subr.bf16.mxu0 %v3024_v60 }
 0x296   : > { %2650 = vmatpush3.bf16.msra.mxu0 %v2925_v25  ;;  %v2957_v25 = vld [vmem:[#allocation4 + $0x58] sm:$0xff]  }
 0x297   : > { %2651 = vmatprep.subr.bf16.mxu0 %v3024_v60 }
 0x29a   : > { %2652 = vmatpush3.bf16.msra.mxu0 %v2926_v27  ;;  %v2959_v27 = vld [vmem:[#allocation4 + $0x68] sm:$0xff]  }
 0x29b   : > { %2717 = vmatprep.subr.bf16.mxu0 %v3024_v60 }
 0x29d   : > { %2654 = vmatmul.mubr.bf16.vlgmr.msra.gmra.mrb[4].mxu0 %v1342_v30  ;;  %v2961_v30 = vld [vmem:[#allocation4 + $0x78] sm:$0xff]  }
 0x29e   : > { %2733 = vmatprep.mubr.msk.bf16.mxu0 %vm3025_vm10, %v3024_v60  ;;  %2718 = vmatpush3.bf16.msra.mxu0 %v2954_v22 }
 0x29f   : > { %2719 = vmatprep.subr.bf16.mxu0 %v3024_v60 }
 0x2a2   : > { %2720 = vmatpush3.bf16.msra.mxu0 %v2955_v23 }
 0x2a3   : > { %2721 = vmatprep.subr.bf16.mxu0 %v3024_v60 }
 0x2a6   : > { %2722 = vmatpush3.bf16.msra.mxu0 %v2956_v24 }
 0x2a7   : > { %2723 = vmatprep.subr.bf16.mxu0 %v3024_v60 }
 0x2aa   : > { %2724 = vmatpush3.bf16.msra.mxu0 %v2957_v25 }
 0x2ab   : > { %2725 = vmatprep.subr.bf16.mxu0 %v3024_v60 }
 0x2ae   : > { %2726 = vmatpush3.bf16.msra.mxu0 %v2958_v26 }
 0x2af   : > { %2727 = vmatprep.subr.bf16.mxu0 %v3024_v60 }
 0x2b2   : > { %2728 = vmatpush3.bf16.msra.mxu0 %v2959_v27 }
 0x2b3   : > { %2729 = vmatprep.subr.bf16.mxu0 %v3024_v60 }
 0x2b6   : > { %2730 = vmatpush3.bf16.msra.mxu0 %v2960_v28 }
 0x2b7   : > { %2731 = vmatprep.subr.bf16.mxu0 %v3024_v60 }
 0x2ba   : > { %2732 = vmatpush3.bf16.msra.mxu0 %v2961_v30 }
 0x2bb   : > { %2737 = vmatprep.subr.bf16.mxu0 %v3024_v60 }
 0x370   : > { %v1426_v39 = vpop.f32.mrb[4].mxu0 }
 0x371   : > { %v3514_v41 = vadd.f32 %v1426_v39, %v3398_v51  ;;  %v2655_v42 = vpop.f32.mrb[5].mxu0 }
 0x372   : > { %v1429_v44 = vpop.f32.mrb[6].mxu0 }
 0x373   : > { %v1441_v45 = vmul.f32 %v2406_v40, %v3514_v41  ;;  %v2656_v46 = vpop.f32.mrb[7].mxu0 }
 0x375   : > { %v1449_v47 = vadd.f32 %v2407_v43, %v1441_v45 }
 0x377   : > { %v1450_v48 = vmax.f32 %v1449_v47, 0.0 }
 0x379   : > { %v2502_v49 = vpack.c.bf16 %v1450_v48, %v1450_v48 }
 0x37b   : > { %v1456_v50 = vshrl.u32 %v2502_v49, 16  ;;  %v1459_v53 = vshll.u32 %v2502_v49, 16 }
 0x37d   : > { %v1458_v52 = vrot.slane %v1456_v50, 7 }
 0x37f   : > { %v1461_v54 = vor.u32 %v1459_v53, %v1458_v52  ;;  %v1462_v55 = vrot.slane %v1458_v52, 4 }
 0x381   : > { %v1465_v51 = vsel %vm3201_vm9, %v1461_v54, %v3404_v5  ;;  %v1468_v57 = vsel %vm3156_vm3, %v1462_v55, %v1467_v56  ;;  %v2938_v5 = vld [vmem:[%s3652_s10 + $0x8] sm:$0xff]  }
 0x382   : > { %1466 = vst [vmem:[#allocation3] sm:$0xf] %v1465_v51  ;;  %1469 = vst [vmem:[#allocation3 + $0x4] sm:$0x1] %v1468_v57  ;;  %v2963_v51 = vld [vmem:[#allocation4] sm:$0xff]  }
 0x389   : > { %v3525_v58 = vld [vmem:[#allocation3] sm:$0xf]  ;;  %v1487_v59 = vld [vmem:[#allocation3 + $0x4] sm:$0x1] }
 0x38a   : > { %v2425_v61 = vcombine.low %v3525_v58, %v1487_v59  ;;  %v1694_v18 = vld [vmem:[#allocation3] sm:$0xe]  ;;  %v1839_v47 = vld [vmem:[#allocation3 + $0x4] sm:$0x1] }
 0x38b   : > { %v2458_v20 = vcombine.low %v1694_v18, %v1487_v59  ;;  %v2964_v59 = vld [vmem:[#allocation4 + $0x8] sm:$0xff]  }
 0x38c   : > { %v1513_v62 = vshll.u32 %v2425_v61, 16  ;;  %v1511_v63 = vshrl.u32 %v2425_v61, 16  ;;  %v2968_v61 = vld [vmem:[#allocation4 + $0x28] sm:$0xff]  }
 0x38d   : > { %v1715_v21 = vrot.slane %v2458_v20, 1 }
 0x38e   : > { %v1515_v2 = vrot.slane %v1513_v62, 1  ;;  %v2969_v62 = vld [vmem:[#allocation4 + $0x30] sm:$0xff]  }
 0x390   : > { %v1516_v4 = vor.u32 %v1515_v2, %v1511_v63  ;;  %v2970_v63 = vld [vmem:[#allocation4 + $0x38] sm:$0xff]   ;;  %v2971_v2 = vld [vmem:[#allocation4 + $0x80] sm:$0xff]  }
 0x392   : > { %2674 = vmatmul.mubr.bf16.vlgmr.msra.gmra.mrb[4].mxu1 %v1516_v4  ;;  %v2973_v4 = vld [vmem:[#allocation4 + $0x90] sm:$0xff]  }
 0x393   : > { %2678 = vmatpush3.bf16.msra.mxu1 %v2937_v3  ;;  %2693 = vmatprep.mubr.msk.bf16.mxu1 %vm3025_vm10, %v3024_v60  ;;  %v2972_v3 = vld [vmem:[#allocation4 + $0x88] sm:$0xff]  }
 0x394   : > { %2679 = vmatprep.subr.bf16.mxu1 %v3024_v60 }
 0x397   : > { %2680 = vmatpush3.bf16.msra.mxu1 %v2938_v5  ;;  %v2974_v5 = vld [vmem:[#allocation4 + $0x98] sm:$0xff]  }
 0x398   : > { %2681 = vmatprep.subr.bf16.mxu1 %v3024_v60 }
 0x39b   : > { %2682 = vmatpush3.bf16.msra.mxu1 %v2939_v6  ;;  %v2975_v6 = vld [vmem:[#allocation4 + $0xa0] sm:$0xff]  }
 0x39c   : > { %2683 = vmatprep.subr.bf16.mxu1 %v3024_v60 }
 0x39f   : > { %2684 = vmatpush3.bf16.msra.mxu1 %v2940_v7  ;;  %v2976_v7 = vld [vmem:[#allocation4 + $0xa8] sm:$0xff]  }
 0x3a0   : > { %2685 = vmatprep.subr.bf16.mxu1 %v3024_v60 }
 0x3a3   : > { %2686 = vmatpush3.bf16.msra.mxu1 %v2941_v8  ;;  %v2977_v8 = vld [vmem:[#allocation4 + $0xb0] sm:$0xff]  }
 0x3a4   : > { %2687 = vmatprep.subr.bf16.mxu1 %v3024_v60 }
 0x3a7   : > { %2688 = vmatpush3.bf16.msra.mxu1 %v2942_v1 }
 0x3a8   : > { %2689 = vmatprep.subr.bf16.mxu1 %v3024_v60 }
 0x3ab   : > { %2690 = vmatpush3.bf16.msra.mxu1 %v2943_v9  ;;  %v2978_v9 = vld [vmem:[#allocation4 + $0xb8] sm:$0xff]  }
 0x3ac   : > { %2691 = vmatprep.subr.bf16.mxu1 %v3024_v60 }
 0x3af   : > { %2692 = vmatpush3.bf16.msra.mxu1 %v2944_v10 }
 0x3b0   : > { %2697 = vmatprep.subr.bf16.mxu1 %v3024_v60 }
 0x3b2   : > { %2694 = vmatmul.mubr.bf16.vlgmr.msra.gmra.mrb[4].mxu1 %v3525_v58 }
 0x3b3   : > { %2698 = vmatpush3.bf16.msra.mxu1 %v2945_v11  ;;  %2713 = vmatprep.mubr.msk.bf16.mxu1 %vm3025_vm10, %v3024_v60 }
 0x3b4   : > { %2699 = vmatprep.subr.bf16.mxu1 %v3024_v60 }
 0x3b7   : > { %2700 = vmatpush3.bf16.msra.mxu1 %v2946_v12 }
 0x3b8   : > { %2701 = vmatprep.subr.bf16.mxu1 %v3024_v60 }
 0x3bb   : > { %2702 = vmatpush3.bf16.msra.mxu1 %v2947_v13 }
 0x3bc   : > { %2703 = vmatprep.subr.bf16.mxu1 %v3024_v60 }
 0x3bf   : > { %2704 = vmatpush3.bf16.msra.mxu1 %v2948_v14 }
 0x3c0   : > { %2705 = vmatprep.subr.bf16.mxu1 %v3024_v60 }
 0x3c3   : > { %2706 = vmatpush3.bf16.msra.mxu1 %v2949_v15 }
 0x3c4   : > { %2707 = vmatprep.subr.bf16.mxu1 %v3024_v60 }
 0x3c7   : > { %2708 = vmatpush3.bf16.msra.mxu1 %v2950_v16 }
 0x3c8   : > { %2709 = vmatprep.subr.bf16.mxu1 %v3024_v60 }
 0x3cb   : > { %2710 = vmatpush3.bf16.msra.mxu1 %v2951_v17 }
 0x3cc   : > { %2711 = vmatprep.subr.bf16.mxu1 %v3024_v60 }
 0x3cf   : > { %2712 = vmatpush3.bf16.msra.mxu1 %v2952_v19 }
 0x3d2   : > { %2714 = vmatmul.mubr.bf16.vlgmr.msra.gmra.mrb[4].mxu1 %v1715_v21 }
 0x4a5   : > { %v1799_v32 = vpop.f32.mrb[4].mxu1 }
 0x4a6   : > { %v1813_v34 = vmul.f32 %v2467_v31, %v1799_v32  ;;  %v2715_v35 = vpop.f32.mrb[5].mxu1 }
 0x4a7   : > { %v1802_v36 = vpop.f32.mrb[6].mxu1 }
 0x4a8   : > { %v1821_v37 = vadd.f32 %v2468_v33, %v1813_v34  ;;  %v2716_v38 = vpop.f32.mrb[7].mxu1 }
 0x4aa   : > { %v1822_v39 = vmax.f32 %v1821_v37, 0.0 }
 0x4ac   : > { %v2503_v40 = vpack.c.bf16 %v1822_v39, %v1822_v39 }
 0x4ae   : > { %v1828_v42 = vshrl.u32 %v2503_v40, 16  ;;  %v1831_v44 = vshll.u32 %v2503_v40, 16 }
 0x4b0   : > { %v1830_v43 = vrot.slane %v1828_v42, 7 }
 0x4b2   : > { %v1833_v45 = vor.u32 %v1831_v44, %v1830_v43  ;;  %v1834_v46 = vrot.slane %v1830_v43, 4 }
 0x4b4   : > { %v1837_v48 = vsel %vm3201_vm9, %v1833_v45, %v3525_v58  ;;  %v1840_v49 = vsel %vm3156_vm3, %v1834_v46, %v1839_v47  ;;  %v2967_v58 = vld [vmem:[#allocation4 + $0x20] sm:$0xff]  }
 0x4b5   : > { %1838 = vst [vmem:[#allocation3] sm:$0xf] %v1837_v48  ;;  %1841 = vst [vmem:[#allocation3 + $0x4] sm:$0x1] %v1840_v49 }
 0x4bc   : > { %v1842_v50 = vld [vmem:[#allocation3] sm:$0xf]  ;;  %v1859_v52 = vld [vmem:[#allocation3 + $0x4] sm:$0x1] }
 0x4bd   : > { %v2470_v53 = vcombine.low %v1842_v50, %v1859_v52  ;;  %v2066_v1 = vld [vmem:[#allocation3] sm:$0xe] }
 0x4be   : > { %v2487_v10 = vcombine.low %v2066_v1, %v1859_v52 }
 0x4bf   : > { %v1885_v54 = vshll.u32 %v2470_v53, 16  ;;  %v1883_v55 = vshrl.u32 %v2470_v53, 16 }
 0x4c0   : > { %v2087_v11 = vrot.slane %v2487_v10, 1 }
 0x4c1   : > { %v1887_v56 = vrot.slane %v1885_v54, 1 }
 0x4c3   : > { %v1888_v57 = vor.u32 %v1887_v56, %v1883_v55 }
 0x4c5   : > { %2734 = vmatmul.mubr.bf16.vlgmr.msra.gmra.mrb[8].mxu0 %v1888_v57 }
 0x4c6   : > { %2738 = vmatpush3.bf16.msra.mxu0 %v2963_v51  ;;  %2753 = vmatprep.mubr.msk.bf16.mxu0 %vm3025_vm10, %v3024_v60 }
 0x4c7   : > { %2739 = vmatprep.subr.bf16.mxu0 %v3024_v60 }
 0x4ca   : > { %2740 = vmatpush3.bf16.msra.mxu0 %v2964_v59 }
 0x4cb   : > { %2741 = vmatprep.subr.bf16.mxu0 %v3024_v60 }
 0x4ce   : > { %2742 = vmatpush3.bf16.msra.mxu0 %v2965_v0 }
 0x4cf   : > { %2743 = vmatprep.subr.bf16.mxu0 %v3024_v60 }
 0x4d2   : > { %2744 = vmatpush3.bf16.msra.mxu0 %v2966_v29 }
 0x4d3   : > { %2745 = vmatprep.subr.bf16.mxu0 %v3024_v60 }
 0x4d6   : > { %2746 = vmatpush3.bf16.msra.mxu0 %v2967_v58 }
 0x4d7   : > { %2747 = vmatprep.subr.bf16.mxu0 %v3024_v60 }
 0x4da   : > { %2748 = vmatpush3.bf16.msra.mxu0 %v2968_v61 }
 0x4db   : > { %2749 = vmatprep.subr.bf16.mxu0 %v3024_v60 }
 0x4de   : > { %2750 = vmatpush3.bf16.msra.mxu0 %v2969_v62 }
 0x4df   : > { %2751 = vmatprep.subr.bf16.mxu0 %v3024_v60 }
 0x4e2   : > { %2752 = vmatpush3.bf16.msra.mxu0 %v2970_v63 }
 0x4e3   : > { %2757 = vmatprep.subr.bf16.mxu0 %v3024_v60 }
 0x4e5   : > { %2754 = vmatmul.mubr.bf16.vlgmr.msra.gmra.mrb[12].mxu0 %v1842_v50 }
 0x4e6   : > { %2758 = vmatpush3.bf16.msra.mxu0 %v2971_v2  ;;  %2773 = vmatprep.mubr.msk.bf16.mxu0 %vm3025_vm10, %v3024_v60 }
 0x4e7   : > { %2759 = vmatprep.subr.bf16.mxu0 %v3024_v60 }
 0x4ea   : > { %2760 = vmatpush3.bf16.msra.mxu0 %v2972_v3 }
 0x4eb   : > { %2761 = vmatprep.subr.bf16.mxu0 %v3024_v60 }
 0x4ee   : > { %2762 = vmatpush3.bf16.msra.mxu0 %v2973_v4 }
 0x4ef   : > { %2763 = vmatprep.subr.bf16.mxu0 %v3024_v60 }
 0x4f2   : > { %2764 = vmatpush3.bf16.msra.mxu0 %v2974_v5 }
 0x4f3   : > { %2765 = vmatprep.subr.bf16.mxu0 %v3024_v60 }
 0x4f6   : > { %2766 = vmatpush3.bf16.msra.mxu0 %v2975_v6 }
 0x4f7   : > { %2767 = vmatprep.subr.bf16.mxu0 %v3024_v60 }
 0x4fa   : > { %2768 = vmatpush3.bf16.msra.mxu0 %v2976_v7 }
 0x4fb   : > { %2769 = vmatprep.subr.bf16.mxu0 %v3024_v60 }
 0x4fe   : > { %2770 = vmatpush3.bf16.msra.mxu0 %v2977_v8 }
 0x4ff   : > { %2771 = vmatprep.subr.bf16.mxu0 %v3024_v60 }
 0x502   : > { %2772 = vmatpush3.bf16.msra.mxu0 %v2978_v9 }
 0x505   : > { %2774 = vmatmul.mubr.bf16.vlgmr.msra.gmra.mrb[16].mxu0 %v2087_v11 }
 0x598   : > { %v1972_v12 = vpop.f32.mrb[8].mxu0 }
 0x599   : > { %v2735_v13 = vpop.f32.mrb[9].mxu0 }
 0x59a   : > { %v1975_v14 = vpop.f32.mrb[10].mxu0 }
 0x59b   : > { %v2736_v15 = vpop.f32.mrb[11].mxu0 }
 0x5b8   : > { %v2060_v16 = vpop.f32.mrb[12].mxu0 }
 0x5b9   : > { %v2061_v17 = vadd.f32 %v2060_v16, %v1972_v12  ;;  %v2755_v18 = vpop.f32.mrb[13].mxu0 }
 0x5ba   : > { %v2063_v19 = vpop.f32.mrb[14].mxu0 }
 0x5bb   : > { %v2756_v20 = vpop.f32.mrb[15].mxu0 }
 0x5d8   : > { %v2171_v21 = vpop.f32.mrb[16].mxu0 }
 0x5d9   : > { %v2177_v22 = vadd.f32 %v2171_v21, %v2061_v17  ;;  %v2775_v23 = vpop.f32.mrb[17].mxu0 }
 0x5da   : > { %v2174_v60 = vpop.f32.mrb[18].mxu0 }
 0x5db   : > { %v2178_v24 = vadd.f32 %v2177_v22, %v3514_v41  ;;  %v2776_v25 = vpop.f32.mrb[19].mxu0 }
 0x5dd   : > { %2179 = vst [vmem:[%s480_s26] sm:$0xff] %v2178_v24 }
 0x5de PF: > { %s25_s29 = sadd.s32 1, %s3018_s29  }
 0x5df   : > { %p22_p3 = scmp.ge.s32.totalorder %s25_s29, 4  }
 0x5e1   :  { %24 = sbr.rel (!%p22_p3) target bundleno = 1 (0x1), region = 119 }
 0x5e8   :  { %2199 = vsyncpa [#allocation5], 1 }
 0x5e9   :  { %2201 = vsyncpa [#allocation5 + $0x1], 1 }

</bundles_post_ra>
